<compile_context>
chip_gen: v7x
topology: tpu7x:2x2x1
jax: 0.10.0
libtpu: 0.0.40
codegen_flags: <defaults>
</compile_context>

<pallas_src>
import jax
import jax.numpy as jnp
from jax import lax
from jax.experimental import pallas as pl
from jax.experimental.pallas import tpu as pltpu

# ---------------- small synthetic BERT config ----------------
VOCAB = 100
HIDDEN = 32
N_LAYERS = 2
N_HEADS = 4
HEAD_DIM = HIDDEN // N_HEADS
FFN = 64
MAX_POS = 16
N_CLASSES = 12
LN_EPS = 1e-12

BATCH = 2
SEQ = 8

_VMEM = pl.BlockSpec(memory_space=pltpu.MemorySpace.VMEM)
_N_KERNEL_INPUTS = 20


def _layernorm(x, g, b):
    mu = jnp.mean(x, axis=-1, keepdims=True)
    xc = x - mu
    var = jnp.mean(xc * xc, axis=-1, keepdims=True)
    return xc * lax.rsqrt(var + LN_EPS) * g + b


# ---------------- single fused Pallas kernel ----------------
def _bert_classifier_kernel(
        emb_ref, bias_ref,                       # activations / (B*S, B*S) attn bias
        emb_ln_g_ref, emb_ln_b_ref,              # embedding LayerNorm
        wqkv_ref, bqkv_ref,                      # per-layer fused QKV   (L, H, 3H)/(L, 1, 3H)
        wo_ref, bo_ref,                          # attn output proj      (L, H, H)/(L, 1, H)
        ln1_g_ref, ln1_b_ref,                    # post-attention LN     (L, 1, H)
        w1_ref, b1_ref,                          # FFN up                (L, H, FFN)/(L, 1, FFN)
        w2_ref, b2_ref,                          # FFN down              (L, FFN, H)/(L, 1, H)
        ln2_g_ref, ln2_b_ref,                    # post-FFN LN           (L, 1, H)
        pool_w_ref, pool_b_ref,                  # pooler                (H, H)/(1, H)
        cls_w_ref, cls_b_ref,                    # classifier            (H, C)/(1, C)
        out_ref):                                # logits                (B, C)
    # --- embeddings LayerNorm (no residual) ---
    x = _layernorm(emb_ref[...], emb_ln_g_ref[...], emb_ln_b_ref[...])   # (B*S, H)
    # block-diagonal attention bias: padding bias inside batch blocks,
    # -1e9 on cross-batch blocks (precomputed in the wrapper)
    bias = bias_ref[...]                                                   # (B*S, B*S)
    dot_qk = (((1,), (1,)), ((), ()))   # contract q/k on the head dim (no K transpose)

    # --- transformer layers (static unroll, N_LAYERS = 2) ---
    for li in range(N_LAYERS):
        # fused QKV projection: one (B*S, H) @ (H, 3H) MXU push.
        # 1/sqrt(dh) is already folded into the Q columns of wqkv/bqkv.
        qkv = jnp.dot(x, wqkv_ref[li],
                      preferred_element_type=jnp.float32) + bqkv_ref[li]  # (B*S, 3H)

        # batch-merged multi-head attention: per head, one (B*S, B*S) score
        # matmul and one context matmul over the whole flattened batch.
        ctx_heads = []
        for h in range(N_HEADS):
            c0 = h * HEAD_DIM
            q = qkv[:, c0:c0 + HEAD_DIM]                                   # (B*S, dh)
            k = qkv[:, HIDDEN + c0:HIDDEN + c0 + HEAD_DIM]
            v = qkv[:, 2 * HIDDEN + c0:2 * HIDDEN + c0 + HEAD_DIM]
            s = lax.dot_general(q, k, dot_qk,
                                preferred_element_type=jnp.float32)       # (B*S, B*S)
            s = s + bias
            s = s - jnp.max(s, axis=-1, keepdims=True)
            p = jnp.exp(s)
            p = p * pl.reciprocal(jnp.sum(p, axis=-1, keepdims=True),
                                  approx=True)
            ctx_heads.append(jnp.dot(p, v,
                                     preferred_element_type=jnp.float32))  # (B*S, dh)

        # merge heads along lanes, single output projection per layer
        ctx = jnp.concatenate(ctx_heads, axis=-1)                          # (B*S, H)
        attn_out = jnp.dot(ctx, wo_ref[li],
                           preferred_element_type=jnp.float32) + bo_ref[li]

        x = _layernorm(attn_out + x, ln1_g_ref[li], ln1_b_ref[li])

        ff = jnp.dot(x, w1_ref[li],
                     preferred_element_type=jnp.float32) + b1_ref[li]      # (B*S, FFN)
        # TODO(synk): HF BERT uses erf-based GELU; tanh approximation kept for
        # Mosaic-safe lowering (numerically very close).
        ff = jax.nn.gelu(ff, approximate=True)
        ff = jnp.dot(ff, w2_ref[li],
                     preferred_element_type=jnp.float32) + b2_ref[li]      # (B*S, H)
        x = _layernorm(ff + x, ln2_g_ref[li], ln2_b_ref[li])

    # --- [CLS] rows: static, sublane-aligned row slices (rows 0, SEQ, ...) ---
    cls = jnp.concatenate([x[b * SEQ:b * SEQ + 1, :] for b in range(BATCH)],
                          axis=0)                                          # (B, H)

    # --- BERT pooler: tanh(Linear([CLS])); dropout(p=0.1) is identity at eval ---
    pooled = jnp.tanh(
        jnp.dot(cls, pool_w_ref[...], preferred_element_type=jnp.float32)
        + pool_b_ref[...])

    # --- classifier head ---
    out_ref[...] = (jnp.dot(pooled, cls_w_ref[...],
                            preferred_element_type=jnp.float32)
                    + cls_b_ref[...])


# ---------------- deterministic parameter init ----------------
def init_params(key):
    def dense(k, fan_in, fan_out):
        kw, _ = jax.random.split(k)
        return (0.02 * jax.random.normal(kw, (fan_in, fan_out), jnp.float32),
                jnp.zeros((fan_out,), jnp.float32))

    keys = jax.random.split(key, 8 + N_LAYERS)
    p = {
        "word_emb": 0.02 * jax.random.normal(keys[0], (VOCAB, HIDDEN), jnp.float32),
        "pos_emb": 0.02 * jax.random.normal(keys[1], (MAX_POS, HIDDEN), jnp.float32),
        "type_emb": 0.02 * jax.random.normal(keys[2], (2, HIDDEN), jnp.float32),
        "emb_ln_g": jnp.ones((1, HIDDEN), jnp.float32),
        "emb_ln_b": jnp.zeros((1, HIDDEN), jnp.float32),
    }

    scale = 1.0 / (float(HEAD_DIM) ** 0.5)   # folded into Q weights/bias

    wqkv, bqkv, wo, bo = [], [], [], []
    w1, b1, w2, b2 = [], [], [], []
    ln1_g, ln1_b, ln2_g, ln2_b = [], [], [], []
    for li in range(N_LAYERS):
        lk = jax.random.split(keys[3 + li], 6)
        wq, bq_ = dense(lk[0], HIDDEN, HIDDEN)
        wk, bk_ = dense(lk[1], HIDDEN, HIDDEN)
        wv, bv_ = dense(lk[2], HIDDEN, HIDDEN)
        wo_l, bo_l = dense(lk[3], HIDDEN, HIDDEN)
        w1_l, b1_l = dense(lk[4], HIDDEN, FFN)
        w2_l, b2_l = dense(lk[5], FFN, HIDDEN)
        wqkv.append(jnp.concatenate([wq * scale, wk, wv], axis=1))        # (H, 3H)
        bqkv.append(jnp.concatenate([bq_ * scale, bk_, bv_])[None, :])    # (1, 3H)
        wo.append(wo_l)
        bo.append(bo_l[None, :])
        w1.append(w1_l)
        b1.append(b1_l[None, :])
        w2.append(w2_l)
        b2.append(b2_l[None, :])
        ln1_g.append(jnp.ones((1, HIDDEN), jnp.float32))
        ln1_b.append(jnp.zeros((1, HIDDEN), jnp.float32))
        ln2_g.append(jnp.ones((1, HIDDEN), jnp.float32))
        ln2_b.append(jnp.zeros((1, HIDDEN), jnp.float32))

    p["wqkv"] = jnp.stack(wqkv)
    p["bqkv"] = jnp.stack(bqkv)
    p["wo"] = jnp.stack(wo)
    p["bo"] = jnp.stack(bo)
    p["w1"] = jnp.stack(w1)
    p["b1"] = jnp.stack(b1)
    p["w2"] = jnp.stack(w2)
    p["b2"] = jnp.stack(b2)
    p["ln1_g"] = jnp.stack(ln1_g)
    p["ln1_b"] = jnp.stack(ln1_b)
    p["ln2_g"] = jnp.stack(ln2_g)
    p["ln2_b"] = jnp.stack(ln2_b)

    pool_w, pool_b = dense(keys[3 + N_LAYERS], HIDDEN, HIDDEN)
    cls_w, cls_b = dense(keys[4 + N_LAYERS], HIDDEN, N_CLASSES)
    p["pool_w"], p["pool_b"] = pool_w, pool_b[None, :]
    p["cls_w"], p["cls_b"] = cls_w, cls_b[None, :]
    return p


# ---------------- forward pass (one pallas_call) ----------------
def text_classifier_forward(params, input_ids, attention_mask):
    b, s = input_ids.shape
    bs = b * s

    # Embedding gathers stay in JAX (data-dependent indexing); everything after
    # the embedding sum runs inside the fused kernel.
    we = jnp.take(params["word_emb"], input_ids, axis=0)          # (B, S, H)
    pe = params["pos_emb"][:s][None, :, :]                        # (1, S, H)
    te = params["type_emb"][0][None, None, :]                     # (1, 1, H); token_type_ids == 0
    emb = (we + pe + te).reshape(bs, HIDDEN).astype(jnp.float32)

    # block-diagonal (B*S, B*S) additive attention bias:
    #   same-batch block  -> padding bias of the key position
    #   cross-batch block -> -1e9 (keeps batches independent after softmax)
    pad_flat = ((1.0 - attention_mask.astype(jnp.float32)) * -10000.0).reshape(bs)
    batch_q = jnp.arange(bs, dtype=jnp.int32) // s
    same = batch_q[:, None] == batch_q[None, :]
    attn_bias = jnp.where(same, pad_flat[None, :], jnp.float32(-1e9))     # (B*S, B*S)

    return pl.pallas_call(
        _bert_classifier_kernel,
        out_shape=jax.ShapeDtypeStruct((b, N_CLASSES), jnp.float32),
        in_specs=[_VMEM] * _N_KERNEL_INPUTS,
        out_specs=_VMEM,
    )(emb, attn_bias,
      params["emb_ln_g"], params["emb_ln_b"],
      params["wqkv"], params["bqkv"],
      params["wo"], params["bo"],
      params["ln1_g"], params["ln1_b"],
      params["w1"], params["b1"],
      params["w2"], params["b2"],
      params["ln2_g"], params["ln2_b"],
      params["pool_w"], params["pool_b"],
      params["cls_w"], params["cls_b"])


if __name__ == "__main__":
    key = jax.random.PRNGKey(0)
    k_params, k_ids = jax.random.split(key)
    params = init_params(k_params)

    input_ids = jax.random.randint(k_ids, (BATCH, SEQ), 0, VOCAB, dtype=jnp.int32)
    # last two tokens of the second sequence are padding
    attention_mask = jnp.array(
        [[1, 1, 1, 1, 1, 1, 1, 1],
         [1, 1, 1, 1, 1, 1, 0, 0]], dtype=jnp.int32)

    logits = jax.jit(text_classifier_forward)(params, input_ids, attention_mask)
    logits = jax.block_until_ready(logits)
    assert logits.shape == (BATCH, N_CLASSES) and logits.dtype == jnp.float32
    print("KERNEL_OK")
</pallas_src>

<mosaic_0001>
module attributes {stable_mosaic.version = 11 : i64} {
  func.func @_bert_classifier_kernel(%arg0: memref<16x32xf32, #tpu.memory_space<vmem>>, %arg1: memref<16x16xf32, #tpu.memory_space<vmem>>, %arg2: memref<1x32xf32, #tpu.memory_space<vmem>>, %arg3: memref<1x32xf32, #tpu.memory_space<vmem>>, %arg4: memref<2x32x96xf32, #tpu.memory_space<vmem>>, %arg5: memref<2x1x96xf32, #tpu.memory_space<vmem>>, %arg6: memref<2x32x32xf32, #tpu.memory_space<vmem>>, %arg7: memref<2x1x32xf32, #tpu.memory_space<vmem>>, %arg8: memref<2x1x32xf32, #tpu.memory_space<vmem>>, %arg9: memref<2x1x32xf32, #tpu.memory_space<vmem>>, %arg10: memref<2x32x64xf32, #tpu.memory_space<vmem>>, %arg11: memref<2x1x64xf32, #tpu.memory_space<vmem>>, %arg12: memref<2x64x32xf32, #tpu.memory_space<vmem>>, %arg13: memref<2x1x32xf32, #tpu.memory_space<vmem>>, %arg14: memref<2x1x32xf32, #tpu.memory_space<vmem>>, %arg15: memref<2x1x32xf32, #tpu.memory_space<vmem>>, %arg16: memref<32x32xf32, #tpu.memory_space<vmem>>, %arg17: memref<1x32xf32, #tpu.memory_space<vmem>>, %arg18: memref<32x12xf32, #tpu.memory_space<vmem>>, %arg19: memref<1x12xf32, #tpu.memory_space<vmem>>, %arg20: memref<2x12xf32, #tpu.memory_space<vmem>>) attributes {dimension_semantics = [], scalar_prefetch = 0 : i64, scratch_operands = 0 : i64, tpu.core_type = #tpu.core_type<tc>} {
    %c0 = arith.constant 0 : index
    %c0_0 = arith.constant 0 : index
    %0 = vector.load %arg0[%c0, %c0_0] : memref<16x32xf32, #tpu.memory_space<vmem>>, vector<16x32xf32>
    %c0_1 = arith.constant 0 : index
    %c0_2 = arith.constant 0 : index
    %1 = vector.load %arg2[%c0_1, %c0_2] : memref<1x32xf32, #tpu.memory_space<vmem>>, vector<1x32xf32>
    %c0_3 = arith.constant 0 : index
    %c0_4 = arith.constant 0 : index
    %2 = vector.load %arg3[%c0_3, %c0_4] : memref<1x32xf32, #tpu.memory_space<vmem>>, vector<1x32xf32>
    %cst = arith.constant dense<0.000000e+00> : vector<16xf32>
    %3 = vector.multi_reduction <add>, %0, %cst [1] : vector<16x32xf32> to vector<16xf32>
    %4 = vector.shape_cast %3 : vector<16xf32> to vector<16x1xf32>
    %cst_5 = arith.constant 3.200000e+01 : f32
    %5 = vector.broadcast %cst_5 : f32 to vector<16x1xf32>
    %6 = arith.divf %4, %5 : vector<16x1xf32>
    %7 = vector.broadcast %6 : vector<16x1xf32> to vector<16x32xf32>
    %8 = arith.subf %0, %7 : vector<16x32xf32>
    %9 = arith.mulf %8, %8 : vector<16x32xf32>
    %cst_6 = arith.constant dense<0.000000e+00> : vector<16xf32>
    %10 = vector.multi_reduction <add>, %9, %cst_6 [1] : vector<16x32xf32> to vector<16xf32>
    %11 = vector.shape_cast %10 : vector<16xf32> to vector<16x1xf32>
    %cst_7 = arith.constant 3.200000e+01 : f32
    %12 = vector.broadcast %cst_7 : f32 to vector<16x1xf32>
    %13 = arith.divf %11, %12 : vector<16x1xf32>
    %cst_8 = arith.constant 9.99999996E-13 : f32
    %14 = vector.broadcast %cst_8 : f32 to vector<16x1xf32>
    %15 = arith.addf %13, %14 : vector<16x1xf32>
    %16 = math.rsqrt %15 : vector<16x1xf32>
    %17 = vector.broadcast %16 : vector<16x1xf32> to vector<16x32xf32>
    %18 = arith.mulf %8, %17 : vector<16x32xf32>
    %19 = vector.broadcast %1 : vector<1x32xf32> to vector<16x32xf32>
    %20 = arith.mulf %18, %19 : vector<16x32xf32>
    %21 = vector.broadcast %2 : vector<1x32xf32> to vector<16x32xf32>
    %22 = arith.addf %20, %21 : vector<16x32xf32>
    %c0_9 = arith.constant 0 : index
    %c0_10 = arith.constant 0 : index
    %23 = vector.load %arg1[%c0_9, %c0_10] : memref<16x16xf32, #tpu.memory_space<vmem>>, vector<16x16xf32>
    %c0_11 = arith.constant 0 : index
    %c0_12 = arith.constant 0 : index
    %c0_13 = arith.constant 0 : index
    %24 = vector.load %arg4[%c0_11, %c0_12, %c0_13] : memref<2x32x96xf32, #tpu.memory_space<vmem>>, vector<1x32x96xf32>
    %25 = vector.shape_cast %24 : vector<1x32x96xf32> to vector<32x96xf32>
    %cst_14 = arith.constant dense<0.000000e+00> : vector<16x96xf32>
    %26 = tpu.matmul %22, %25, %cst_14 {dimension_numbers = #tpu.dot_dimension_numbers<[1], [0], [0], [1], [0, 0, 1, 1], [], []>} : vector<16x32xf32>, vector<32x96xf32>, vector<16x96xf32> -> vector<16x96xf32>
    %c0_15 = arith.constant 0 : index
    %c0_16 = arith.constant 0 : index
    %c0_17 = arith.constant 0 : index
    %27 = vector.load %arg5[%c0_15, %c0_16, %c0_17] : memref<2x1x96xf32, #tpu.memory_space<vmem>>, vector<1x1x96xf32>
    %28 = vector.shape_cast %27 : vector<1x1x96xf32> to vector<1x96xf32>
    %29 = vector.broadcast %28 : vector<1x96xf32> to vector<16x96xf32>
    %30 = arith.addf %26, %29 : vector<16x96xf32>
    %31 = vector.extract_strided_slice %30 {offsets = [0, 0], sizes = [16, 8], strides = [1, 1]} : vector<16x96xf32> to vector<16x8xf32>
    %32 = vector.extract_strided_slice %30 {offsets = [0, 32], sizes = [16, 8], strides = [1, 1]} : vector<16x96xf32> to vector<16x8xf32>
    %33 = vector.extract_strided_slice %30 {offsets = [0, 64], sizes = [16, 8], strides = [1, 1]} : vector<16x96xf32> to vector<16x8xf32>
    %cst_18 = arith.constant dense<0.000000e+00> : vector<16x16xf32>
    %34 = tpu.matmul %31, %32, %cst_18 {dimension_numbers = #tpu.dot_dimension_numbers<[1], [1], [0], [0], [0, 0, 1, 0], [], []>} : vector<16x8xf32>, vector<16x8xf32>, vector<16x16xf32> -> vector<16x16xf32>
    %35 = arith.addf %34, %23 : vector<16x16xf32>
    %cst_19 = arith.constant dense<0xFF800000> : vector<16xf32>
    %36 = vector.multi_reduction <maximumf>, %35, %cst_19 [1] : vector<16x16xf32> to vector<16xf32>
    %37 = vector.shape_cast %36 : vector<16xf32> to vector<16x1xf32>
    %38 = vector.broadcast %37 : vector<16x1xf32> to vector<16x16xf32>
    %39 = arith.subf %35, %38 : vector<16x16xf32>
    %40 = math.exp %39 : vector<16x16xf32>
    %cst_20 = arith.constant dense<0.000000e+00> : vector<16xf32>
    %41 = vector.multi_reduction <add>, %40, %cst_20 [1] : vector<16x16xf32> to vector<16xf32>
    %42 = vector.shape_cast %41 : vector<16xf32> to vector<16x1xf32>
    %43 = tpu.reciprocal %42 {approx = true} : vector<16x1xf32> -> vector<16x1xf32>
    %44 = vector.broadcast %43 : vector<16x1xf32> to vector<16x16xf32>
    %45 = arith.mulf %40, %44 : vector<16x16xf32>
    %cst_21 = arith.constant dense<0.000000e+00> : vector<16x8xf32>
    %46 = tpu.matmul %45, %33, %cst_21 {dimension_numbers = #tpu.dot_dimension_numbers<[1], [0], [0], [1], [0, 0, 1, 1], [], []>} : vector<16x16xf32>, vector<16x8xf32>, vector<16x8xf32> -> vector<16x8xf32>
    %47 = vector.extract_strided_slice %30 {offsets = [0, 8], sizes = [16, 8], strides = [1, 1]} : vector<16x96xf32> to vector<16x8xf32>
    %48 = vector.extract_strided_slice %30 {offsets = [0, 40], sizes = [16, 8], strides = [1, 1]} : vector<16x96xf32> to vector<16x8xf32>
    %49 = vector.extract_strided_slice %30 {offsets = [0, 72], sizes = [16, 8], strides = [1, 1]} : vector<16x96xf32> to vector<16x8xf32>
    %cst_22 = arith.constant dense<0.000000e+00> : vector<16x16xf32>
    %50 = tpu.matmul %47, %48, %cst_22 {dimension_numbers = #tpu.dot_dimension_numbers<[1], [1], [0], [0], [0, 0, 1, 0], [], []>} : vector<16x8xf32>, vector<16x8xf32>, vector<16x16xf32> -> vector<16x16xf32>
    %51 = arith.addf %50, %23 : vector<16x16xf32>
    %cst_23 = arith.constant dense<0xFF800000> : vector<16xf32>
    %52 = vector.multi_reduction <maximumf>, %51, %cst_23 [1] : vector<16x16xf32> to vector<16xf32>
    %53 = vector.shape_cast %52 : vector<16xf32> to vector<16x1xf32>
    %54 = vector.broadcast %53 : vector<16x1xf32> to vector<16x16xf32>
    %55 = arith.subf %51, %54 : vector<16x16xf32>
    %56 = math.exp %55 : vector<16x16xf32>
    %cst_24 = arith.constant dense<0.000000e+00> : vector<16xf32>
    %57 = vector.multi_reduction <add>, %56, %cst_24 [1] : vector<16x16xf32> to vector<16xf32>
    %58 = vector.shape_cast %57 : vector<16xf32> to vector<16x1xf32>
    %59 = tpu.reciprocal %58 {approx = true} : vector<16x1xf32> -> vector<16x1xf32>
    %60 = vector.broadcast %59 : vector<16x1xf32> to vector<16x16xf32>
    %61 = arith.mulf %56, %60 : vector<16x16xf32>
    %cst_25 = arith.constant dense<0.000000e+00> : vector<16x8xf32>
    %62 = tpu.matmul %61, %49, %cst_25 {dimension_numbers = #tpu.dot_dimension_numbers<[1], [0], [0], [1], [0, 0, 1, 1], [], []>} : vector<16x16xf32>, vector<16x8xf32>, vector<16x8xf32> -> vector<16x8xf32>
    %63 = vector.extract_strided_slice %30 {offsets = [0, 16], sizes = [16, 8], strides = [1, 1]} : vector<16x96xf32> to vector<16x8xf32>
    %64 = vector.extract_strided_slice %30 {offsets = [0, 48], sizes = [16, 8], strides = [1, 1]} : vector<16x96xf32> to vector<16x8xf32>
    %65 = vector.extract_strided_slice %30 {offsets = [0, 80], sizes = [16, 8], strides = [1, 1]} : vector<16x96xf32> to vector<16x8xf32>
    %cst_26 = arith.constant dense<0.000000e+00> : vector<16x16xf32>
    %66 = tpu.matmul %63, %64, %cst_26 {dimension_numbers = #tpu.dot_dimension_numbers<[1], [1], [0], [0], [0, 0, 1, 0], [], []>} : vector<16x8xf32>, vector<16x8xf32>, vector<16x16xf32> -> vector<16x16xf32>
    %67 = arith.addf %66, %23 : vector<16x16xf32>
    %cst_27 = arith.constant dense<0xFF800000> : vector<16xf32>
    %68 = vector.multi_reduction <maximumf>, %67, %cst_27 [1] : vector<16x16xf32> to vector<16xf32>
    %69 = vector.shape_cast %68 : vector<16xf32> to vector<16x1xf32>
    %70 = vector.broadcast %69 : vector<16x1xf32> to vector<16x16xf32>
    %71 = arith.subf %67, %70 : vector<16x16xf32>
    %72 = math.exp %71 : vector<16x16xf32>
    %cst_28 = arith.constant dense<0.000000e+00> : vector<16xf32>
    %73 = vector.multi_reduction <add>, %72, %cst_28 [1] : vector<16x16xf32> to vector<16xf32>
    %74 = vector.shape_cast %73 : vector<16xf32> to vector<16x1xf32>
    %75 = tpu.reciprocal %74 {approx = true} : vector<16x1xf32> -> vector<16x1xf32>
    %76 = vector.broadcast %75 : vector<16x1xf32> to vector<16x16xf32>
    %77 = arith.mulf %72, %76 : vector<16x16xf32>
    %cst_29 = arith.constant dense<0.000000e+00> : vector<16x8xf32>
    %78 = tpu.matmul %77, %65, %cst_29 {dimension_numbers = #tpu.dot_dimension_numbers<[1], [0], [0], [1], [0, 0, 1, 1], [], []>} : vector<16x16xf32>, vector<16x8xf32>, vector<16x8xf32> -> vector<16x8xf32>
    %79 = vector.extract_strided_slice %30 {offsets = [0, 24], sizes = [16, 8], strides = [1, 1]} : vector<16x96xf32> to vector<16x8xf32>
    %80 = vector.extract_strided_slice %30 {offsets = [0, 56], sizes = [16, 8], strides = [1, 1]} : vector<16x96xf32> to vector<16x8xf32>
    %81 = vector.extract_strided_slice %30 {offsets = [0, 88], sizes = [16, 8], strides = [1, 1]} : vector<16x96xf32> to vector<16x8xf32>
    %cst_30 = arith.constant dense<0.000000e+00> : vector<16x16xf32>
    %82 = tpu.matmul %79, %80, %cst_30 {dimension_numbers = #tpu.dot_dimension_numbers<[1], [1], [0], [0], [0, 0, 1, 0], [], []>} : vector<16x8xf32>, vector<16x8xf32>, vector<16x16xf32> -> vector<16x16xf32>
    %83 = arith.addf %82, %23 : vector<16x16xf32>
    %cst_31 = arith.constant dense<0xFF800000> : vector<16xf32>
    %84 = vector.multi_reduction <maximumf>, %83, %cst_31 [1] : vector<16x16xf32> to vector<16xf32>
    %85 = vector.shape_cast %84 : vector<16xf32> to vector<16x1xf32>
    %86 = vector.broadcast %85 : vector<16x1xf32> to vector<16x16xf32>
    %87 = arith.subf %83, %86 : vector<16x16xf32>
    %88 = math.exp %87 : vector<16x16xf32>
    %cst_32 = arith.constant dense<0.000000e+00> : vector<16xf32>
    %89 = vector.multi_reduction <add>, %88, %cst_32 [1] : vector<16x16xf32> to vector<16xf32>
    %90 = vector.shape_cast %89 : vector<16xf32> to vector<16x1xf32>
    %91 = tpu.reciprocal %90 {approx = true} : vector<16x1xf32> -> vector<16x1xf32>
    %92 = vector.broadcast %91 : vector<16x1xf32> to vector<16x16xf32>
    %93 = arith.mulf %88, %92 : vector<16x16xf32>
    %cst_33 = arith.constant dense<0.000000e+00> : vector<16x8xf32>
    %94 = tpu.matmul %93, %81, %cst_33 {dimension_numbers = #tpu.dot_dimension_numbers<[1], [0], [0], [1], [0, 0, 1, 1], [], []>} : vector<16x16xf32>, vector<16x8xf32>, vector<16x8xf32> -> vector<16x8xf32>
    %95 = tpu.concatenate %46, %62, %78, %94 in 1 : vector<16x8xf32>, vector<16x8xf32>, vector<16x8xf32>, vector<16x8xf32> -> vector<16x32xf32>
    %c0_34 = arith.constant 0 : index
    %c0_35 = arith.constant 0 : index
    %c0_36 = arith.constant 0 : index
    %96 = vector.load %arg6[%c0_34, %c0_35, %c0_36] : memref<2x32x32xf32, #tpu.memory_space<vmem>>, vector<1x32x32xf32>
    %97 = vector.shape_cast %96 : vector<1x32x32xf32> to vector<32x32xf32>
    %cst_37 = arith.constant dense<0.000000e+00> : vector<16x32xf32>
    %98 = tpu.matmul %95, %97, %cst_37 {dimension_numbers = #tpu.dot_dimension_numbers<[1], [0], [0], [1], [0, 0, 1, 1], [], []>} : vector<16x32xf32>, vector<32x32xf32>, vector<16x32xf32> -> vector<16x32xf32>
    %c0_38 = arith.constant 0 : index
    %c0_39 = arith.constant 0 : index
    %c0_40 = arith.constant 0 : index
    %99 = vector.load %arg7[%c0_38, %c0_39, %c0_40] : memref<2x1x32xf32, #tpu.memory_space<vmem>>, vector<1x1x32xf32>
    %100 = vector.shape_cast %99 : vector<1x1x32xf32> to vector<1x32xf32>
    %101 = vector.broadcast %100 : vector<1x32xf32> to vector<16x32xf32>
    %102 = arith.addf %98, %101 : vector<16x32xf32>
    %103 = arith.addf %102, %22 : vector<16x32xf32>
    %c0_41 = arith.constant 0 : index
    %c0_42 = arith.constant 0 : index
    %c0_43 = arith.constant 0 : index
    %104 = vector.load %arg8[%c0_41, %c0_42, %c0_43] : memref<2x1x32xf32, #tpu.memory_space<vmem>>, vector<1x1x32xf32>
    %105 = vector.shape_cast %104 : vector<1x1x32xf32> to vector<1x32xf32>
    %c0_44 = arith.constant 0 : index
    %c0_45 = arith.constant 0 : index
    %c0_46 = arith.constant 0 : index
    %106 = vector.load %arg9[%c0_44, %c0_45, %c0_46] : memref<2x1x32xf32, #tpu.memory_space<vmem>>, vector<1x1x32xf32>
    %107 = vector.shape_cast %106 : vector<1x1x32xf32> to vector<1x32xf32>
    %cst_47 = arith.constant dense<0.000000e+00> : vector<16xf32>
    %108 = vector.multi_reduction <add>, %103, %cst_47 [1] : vector<16x32xf32> to vector<16xf32>
    %109 = vector.shape_cast %108 : vector<16xf32> to vector<16x1xf32>
    %cst_48 = arith.constant 3.200000e+01 : f32
    %110 = vector.broadcast %cst_48 : f32 to vector<16x1xf32>
    %111 = arith.divf %109, %110 : vector<16x1xf32>
    %112 = vector.broadcast %111 : vector<16x1xf32> to vector<16x32xf32>
    %113 = arith.subf %103, %112 : vector<16x32xf32>
    %114 = arith.mulf %113, %113 : vector<16x32xf32>
    %cst_49 = arith.constant dense<0.000000e+00> : vector<16xf32>
    %115 = vector.multi_reduction <add>, %114, %cst_49 [1] : vector<16x32xf32> to vector<16xf32>
    %116 = vector.shape_cast %115 : vector<16xf32> to vector<16x1xf32>
    %cst_50 = arith.constant 3.200000e+01 : f32
    %117 = vector.broadcast %cst_50 : f32 to vector<16x1xf32>
    %118 = arith.divf %116, %117 : vector<16x1xf32>
    %cst_51 = arith.constant 9.99999996E-13 : f32
    %119 = vector.broadcast %cst_51 : f32 to vector<16x1xf32>
    %120 = arith.addf %118, %119 : vector<16x1xf32>
    %121 = math.rsqrt %120 : vector<16x1xf32>
    %122 = vector.broadcast %121 : vector<16x1xf32> to vector<16x32xf32>
    %123 = arith.mulf %113, %122 : vector<16x32xf32>
    %124 = vector.broadcast %105 : vector<1x32xf32> to vector<16x32xf32>
    %125 = arith.mulf %123, %124 : vector<16x32xf32>
    %126 = vector.broadcast %107 : vector<1x32xf32> to vector<16x32xf32>
    %127 = arith.addf %125, %126 : vector<16x32xf32>
    %c0_52 = arith.constant 0 : index
    %c0_53 = arith.constant 0 : index
    %c0_54 = arith.constant 0 : index
    %128 = vector.load %arg10[%c0_52, %c0_53, %c0_54] : memref<2x32x64xf32, #tpu.memory_space<vmem>>, vector<1x32x64xf32>
    %129 = vector.shape_cast %128 : vector<1x32x64xf32> to vector<32x64xf32>
    %cst_55 = arith.constant dense<0.000000e+00> : vector<16x64xf32>
    %130 = tpu.matmul %127, %129, %cst_55 {dimension_numbers = #tpu.dot_dimension_numbers<[1], [0], [0], [1], [0, 0, 1, 1], [], []>} : vector<16x32xf32>, vector<32x64xf32>, vector<16x64xf32> -> vector<16x64xf32>
    %c0_56 = arith.constant 0 : index
    %c0_57 = arith.constant 0 : index
    %c0_58 = arith.constant 0 : index
    %131 = vector.load %arg11[%c0_56, %c0_57, %c0_58] : memref<2x1x64xf32, #tpu.memory_space<vmem>>, vector<1x1x64xf32>
    %132 = vector.shape_cast %131 : vector<1x1x64xf32> to vector<1x64xf32>
    %133 = vector.broadcast %132 : vector<1x64xf32> to vector<16x64xf32>
    %134 = arith.addf %130, %133 : vector<16x64xf32>
    %135 = arith.mulf %134, %134 : vector<16x64xf32>
    %136 = arith.mulf %134, %135 : vector<16x64xf32>
    %cst_59 = arith.constant 4.471500e-02 : f32
    %137 = vector.broadcast %cst_59 : f32 to vector<16x64xf32>
    %138 = arith.mulf %137, %136 : vector<16x64xf32>
    %139 = arith.addf %134, %138 : vector<16x64xf32>
    %cst_60 = arith.constant 0.797884583 : f32
    %140 = vector.broadcast %cst_60 : f32 to vector<16x64xf32>
    %141 = arith.mulf %140, %139 : vector<16x64xf32>
    %142 = math.tanh %141 : vector<16x64xf32>
    %cst_61 = arith.constant 1.000000e+00 : f32
    %143 = vector.broadcast %cst_61 : f32 to vector<16x64xf32>
    %144 = arith.addf %143, %142 : vector<16x64xf32>
    %cst_62 = arith.constant 5.000000e-01 : f32
    %145 = vector.broadcast %cst_62 : f32 to vector<16x64xf32>
    %146 = arith.mulf %145, %144 : vector<16x64xf32>
    %147 = arith.mulf %134, %146 : vector<16x64xf32>
    %c0_63 = arith.constant 0 : index
    %c0_64 = arith.constant 0 : index
    %c0_65 = arith.constant 0 : index
    %148 = vector.load %arg12[%c0_63, %c0_64, %c0_65] : memref<2x64x32xf32, #tpu.memory_space<vmem>>, vector<1x64x32xf32>
    %149 = vector.shape_cast %148 : vector<1x64x32xf32> to vector<64x32xf32>
    %cst_66 = arith.constant dense<0.000000e+00> : vector<16x32xf32>
    %150 = tpu.matmul %147, %149, %cst_66 {dimension_numbers = #tpu.dot_dimension_numbers<[1], [0], [0], [1], [0, 0, 1, 1], [], []>} : vector<16x64xf32>, vector<64x32xf32>, vector<16x32xf32> -> vector<16x32xf32>
    %c0_67 = arith.constant 0 : index
    %c0_68 = arith.constant 0 : index
    %c0_69 = arith.constant 0 : index
    %151 = vector.load %arg13[%c0_67, %c0_68, %c0_69] : memref<2x1x32xf32, #tpu.memory_space<vmem>>, vector<1x1x32xf32>
    %152 = vector.shape_cast %151 : vector<1x1x32xf32> to vector<1x32xf32>
    %153 = vector.broadcast %152 : vector<1x32xf32> to vector<16x32xf32>
    %154 = arith.addf %150, %153 : vector<16x32xf32>
    %155 = arith.addf %154, %127 : vector<16x32xf32>
    %c0_70 = arith.constant 0 : index
    %c0_71 = arith.constant 0 : index
    %c0_72 = arith.constant 0 : index
    %156 = vector.load %arg14[%c0_70, %c0_71, %c0_72] : memref<2x1x32xf32, #tpu.memory_space<vmem>>, vector<1x1x32xf32>
    %157 = vector.shape_cast %156 : vector<1x1x32xf32> to vector<1x32xf32>
    %c0_73 = arith.constant 0 : index
    %c0_74 = arith.constant 0 : index
    %c0_75 = arith.constant 0 : index
    %158 = vector.load %arg15[%c0_73, %c0_74, %c0_75] : memref<2x1x32xf32, #tpu.memory_space<vmem>>, vector<1x1x32xf32>
    %159 = vector.shape_cast %158 : vector<1x1x32xf32> to vector<1x32xf32>
    %cst_76 = arith.constant dense<0.000000e+00> : vector<16xf32>
    %160 = vector.multi_reduction <add>, %155, %cst_76 [1] : vector<16x32xf32> to vector<16xf32>
    %161 = vector.shape_cast %160 : vector<16xf32> to vector<16x1xf32>
    %cst_77 = arith.constant 3.200000e+01 : f32
    %162 = vector.broadcast %cst_77 : f32 to vector<16x1xf32>
    %163 = arith.divf %161, %162 : vector<16x1xf32>
    %164 = vector.broadcast %163 : vector<16x1xf32> to vector<16x32xf32>
    %165 = arith.subf %155, %164 : vector<16x32xf32>
    %166 = arith.mulf %165, %165 : vector<16x32xf32>
    %cst_78 = arith.constant dense<0.000000e+00> : vector<16xf32>
    %167 = vector.multi_reduction <add>, %166, %cst_78 [1] : vector<16x32xf32> to vector<16xf32>
    %168 = vector.shape_cast %167 : vector<16xf32> to vector<16x1xf32>
    %cst_79 = arith.constant 3.200000e+01 : f32
    %169 = vector.broadcast %cst_79 : f32 to vector<16x1xf32>
    %170 = arith.divf %168, %169 : vector<16x1xf32>
    %cst_80 = arith.constant 9.99999996E-13 : f32
    %171 = vector.broadcast %cst_80 : f32 to vector<16x1xf32>
    %172 = arith.addf %170, %171 : vector<16x1xf32>
    %173 = math.rsqrt %172 : vector<16x1xf32>
    %174 = vector.broadcast %173 : vector<16x1xf32> to vector<16x32xf32>
    %175 = arith.mulf %165, %174 : vector<16x32xf32>
    %176 = vector.broadcast %157 : vector<1x32xf32> to vector<16x32xf32>
    %177 = arith.mulf %175, %176 : vector<16x32xf32>
    %178 = vector.broadcast %159 : vector<1x32xf32> to vector<16x32xf32>
    %179 = arith.addf %177, %178 : vector<16x32xf32>
    %c1 = arith.constant 1 : index
    %c0_81 = arith.constant 0 : index
    %c0_82 = arith.constant 0 : index
    %180 = vector.load %arg4[%c1, %c0_81, %c0_82] : memref<2x32x96xf32, #tpu.memory_space<vmem>>, vector<1x32x96xf32>
    %181 = vector.shape_cast %180 : vector<1x32x96xf32> to vector<32x96xf32>
    %cst_83 = arith.constant dense<0.000000e+00> : vector<16x96xf32>
    %182 = tpu.matmul %179, %181, %cst_83 {dimension_numbers = #tpu.dot_dimension_numbers<[1], [0], [0], [1], [0, 0, 1, 1], [], []>} : vector<16x32xf32>, vector<32x96xf32>, vector<16x96xf32> -> vector<16x96xf32>
    %c1_84 = arith.constant 1 : index
    %c0_85 = arith.constant 0 : index
    %c0_86 = arith.constant 0 : index
    %183 = vector.load %arg5[%c1_84, %c0_85, %c0_86] : memref<2x1x96xf32, #tpu.memory_space<vmem>>, vector<1x1x96xf32>
    %184 = vector.shape_cast %183 : vector<1x1x96xf32> to vector<1x96xf32>
    %185 = vector.broadcast %184 : vector<1x96xf32> to vector<16x96xf32>
    %186 = arith.addf %182, %185 : vector<16x96xf32>
    %187 = vector.extract_strided_slice %186 {offsets = [0, 0], sizes = [16, 8], strides = [1, 1]} : vector<16x96xf32> to vector<16x8xf32>
    %188 = vector.extract_strided_slice %186 {offsets = [0, 32], sizes = [16, 8], strides = [1, 1]} : vector<16x96xf32> to vector<16x8xf32>
    %189 = vector.extract_strided_slice %186 {offsets = [0, 64], sizes = [16, 8], strides = [1, 1]} : vector<16x96xf32> to vector<16x8xf32>
    %cst_87 = arith.constant dense<0.000000e+00> : vector<16x16xf32>
    %190 = tpu.matmul %187, %188, %cst_87 {dimension_numbers = #tpu.dot_dimension_numbers<[1], [1], [0], [0], [0, 0, 1, 0], [], []>} : vector<16x8xf32>, vector<16x8xf32>, vector<16x16xf32> -> vector<16x16xf32>
    %191 = arith.addf %190, %23 : vector<16x16xf32>
    %cst_88 = arith.constant dense<0xFF800000> : vector<16xf32>
    %192 = vector.multi_reduction <maximumf>, %191, %cst_88 [1] : vector<16x16xf32> to vector<16xf32>
    %193 = vector.shape_cast %192 : vector<16xf32> to vector<16x1xf32>
    %194 = vector.broadcast %193 : vector<16x1xf32> to vector<16x16xf32>
    %195 = arith.subf %191, %194 : vector<16x16xf32>
    %196 = math.exp %195 : vector<16x16xf32>
    %cst_89 = arith.constant dense<0.000000e+00> : vector<16xf32>
    %197 = vector.multi_reduction <add>, %196, %cst_89 [1] : vector<16x16xf32> to vector<16xf32>
    %198 = vector.shape_cast %197 : vector<16xf32> to vector<16x1xf32>
    %199 = tpu.reciprocal %198 {approx = true} : vector<16x1xf32> -> vector<16x1xf32>
    %200 = vector.broadcast %199 : vector<16x1xf32> to vector<16x16xf32>
    %201 = arith.mulf %196, %200 : vector<16x16xf32>
    %cst_90 = arith.constant dense<0.000000e+00> : vector<16x8xf32>
    %202 = tpu.matmul %201, %189, %cst_90 {dimension_numbers = #tpu.dot_dimension_numbers<[1], [0], [0], [1], [0, 0, 1, 1], [], []>} : vector<16x16xf32>, vector<16x8xf32>, vector<16x8xf32> -> vector<16x8xf32>
    %203 = vector.extract_strided_slice %186 {offsets = [0, 8], sizes = [16, 8], strides = [1, 1]} : vector<16x96xf32> to vector<16x8xf32>
    %204 = vector.extract_strided_slice %186 {offsets = [0, 40], sizes = [16, 8], strides = [1, 1]} : vector<16x96xf32> to vector<16x8xf32>
    %205 = vector.extract_strided_slice %186 {offsets = [0, 72], sizes = [16, 8], strides = [1, 1]} : vector<16x96xf32> to vector<16x8xf32>
    %cst_91 = arith.constant dense<0.000000e+00> : vector<16x16xf32>
    %206 = tpu.matmul %203, %204, %cst_91 {dimension_numbers = #tpu.dot_dimension_numbers<[1], [1], [0], [0], [0, 0, 1, 0], [], []>} : vector<16x8xf32>, vector<16x8xf32>, vector<16x16xf32> -> vector<16x16xf32>
    %207 = arith.addf %206, %23 : vector<16x16xf32>
    %cst_92 = arith.constant dense<0xFF800000> : vector<16xf32>
    %208 = vector.multi_reduction <maximumf>, %207, %cst_92 [1] : vector<16x16xf32> to vector<16xf32>
    %209 = vector.shape_cast %208 : vector<16xf32> to vector<16x1xf32>
    %210 = vector.broadcast %209 : vector<16x1xf32> to vector<16x16xf32>
    %211 = arith.subf %207, %210 : vector<16x16xf32>
    %212 = math.exp %211 : vector<16x16xf32>
    %cst_93 = arith.constant dense<0.000000e+00> : vector<16xf32>
    %213 = vector.multi_reduction <add>, %212, %cst_93 [1] : vector<16x16xf32> to vector<16xf32>
    %214 = vector.shape_cast %213 : vector<16xf32> to vector<16x1xf32>
    %215 = tpu.reciprocal %214 {approx = true} : vector<16x1xf32> -> vector<16x1xf32>
    %216 = vector.broadcast %215 : vector<16x1xf32> to vector<16x16xf32>
    %217 = arith.mulf %212, %216 : vector<16x16xf32>
    %cst_94 = arith.constant dense<0.000000e+00> : vector<16x8xf32>
    %218 = tpu.matmul %217, %205, %cst_94 {dimension_numbers = #tpu.dot_dimension_numbers<[1], [0], [0], [1], [0, 0, 1, 1], [], []>} : vector<16x16xf32>, vector<16x8xf32>, vector<16x8xf32> -> vector<16x8xf32>
    %219 = vector.extract_strided_slice %186 {offsets = [0, 16], sizes = [16, 8], strides = [1, 1]} : vector<16x96xf32> to vector<16x8xf32>
    %220 = vector.extract_strided_slice %186 {offsets = [0, 48], sizes = [16, 8], strides = [1, 1]} : vector<16x96xf32> to vector<16x8xf32>
    %221 = vector.extract_strided_slice %186 {offsets = [0, 80], sizes = [16, 8], strides = [1, 1]} : vector<16x96xf32> to vector<16x8xf32>
    %cst_95 = arith.constant dense<0.000000e+00> : vector<16x16xf32>
    %222 = tpu.matmul %219, %220, %cst_95 {dimension_numbers = #tpu.dot_dimension_numbers<[1], [1], [0], [0], [0, 0, 1, 0], [], []>} : vector<16x8xf32>, vector<16x8xf32>, vector<16x16xf32> -> vector<16x16xf32>
    %223 = arith.addf %222, %23 : vector<16x16xf32>
    %cst_96 = arith.constant dense<0xFF800000> : vector<16xf32>
    %224 = vector.multi_reduction <maximumf>, %223, %cst_96 [1] : vector<16x16xf32> to vector<16xf32>
    %225 = vector.shape_cast %224 : vector<16xf32> to vector<16x1xf32>
    %226 = vector.broadcast %225 : vector<16x1xf32> to vector<16x16xf32>
    %227 = arith.subf %223, %226 : vector<16x16xf32>
    %228 = math.exp %227 : vector<16x16xf32>
    %cst_97 = arith.constant dense<0.000000e+00> : vector<16xf32>
    %229 = vector.multi_reduction <add>, %228, %cst_97 [1] : vector<16x16xf32> to vector<16xf32>
    %230 = vector.shape_cast %229 : vector<16xf32> to vector<16x1xf32>
    %231 = tpu.reciprocal %230 {approx = true} : vector<16x1xf32> -> vector<16x1xf32>
    %232 = vector.broadcast %231 : vector<16x1xf32> to vector<16x16xf32>
    %233 = arith.mulf %228, %232 : vector<16x16xf32>
    %cst_98 = arith.constant dense<0.000000e+00> : vector<16x8xf32>
    %234 = tpu.matmul %233, %221, %cst_98 {dimension_numbers = #tpu.dot_dimension_numbers<[1], [0], [0], [1], [0, 0, 1, 1], [], []>} : vector<16x16xf32>, vector<16x8xf32>, vector<16x8xf32> -> vector<16x8xf32>
    %235 = vector.extract_strided_slice %186 {offsets = [0, 24], sizes = [16, 8], strides = [1, 1]} : vector<16x96xf32> to vector<16x8xf32>
    %236 = vector.extract_strided_slice %186 {offsets = [0, 56], sizes = [16, 8], strides = [1, 1]} : vector<16x96xf32> to vector<16x8xf32>
    %237 = vector.extract_strided_slice %186 {offsets = [0, 88], sizes = [16, 8], strides = [1, 1]} : vector<16x96xf32> to vector<16x8xf32>
    %cst_99 = arith.constant dense<0.000000e+00> : vector<16x16xf32>
    %238 = tpu.matmul %235, %236, %cst_99 {dimension_numbers = #tpu.dot_dimension_numbers<[1], [1], [0], [0], [0, 0, 1, 0], [], []>} : vector<16x8xf32>, vector<16x8xf32>, vector<16x16xf32> -> vector<16x16xf32>
    %239 = arith.addf %238, %23 : vector<16x16xf32>
    %cst_100 = arith.constant dense<0xFF800000> : vector<16xf32>
    %240 = vector.multi_reduction <maximumf>, %239, %cst_100 [1] : vector<16x16xf32> to vector<16xf32>
    %241 = vector.shape_cast %240 : vector<16xf32> to vector<16x1xf32>
    %242 = vector.broadcast %241 : vector<16x1xf32> to vector<16x16xf32>
    %243 = arith.subf %239, %242 : vector<16x16xf32>
    %244 = math.exp %243 : vector<16x16xf32>
    %cst_101 = arith.constant dense<0.000000e+00> : vector<16xf32>
    %245 = vector.multi_reduction <add>, %244, %cst_101 [1] : vector<16x16xf32> to vector<16xf32>
    %246 = vector.shape_cast %245 : vector<16xf32> to vector<16x1xf32>
    %247 = tpu.reciprocal %246 {approx = true} : vector<16x1xf32> -> vector<16x1xf32>
    %248 = vector.broadcast %247 : vector<16x1xf32> to vector<16x16xf32>
    %249 = arith.mulf %244, %248 : vector<16x16xf32>
    %cst_102 = arith.constant dense<0.000000e+00> : vector<16x8xf32>
    %250 = tpu.matmul %249, %237, %cst_102 {dimension_numbers = #tpu.dot_dimension_numbers<[1], [0], [0], [1], [0, 0, 1, 1], [], []>} : vector<16x16xf32>, vector<16x8xf32>, vector<16x8xf32> -> vector<16x8xf32>
    %251 = tpu.concatenate %202, %218, %234, %250 in 1 : vector<16x8xf32>, vector<16x8xf32>, vector<16x8xf32>, vector<16x8xf32> -> vector<16x32xf32>
    %c1_103 = arith.constant 1 : index
    %c0_104 = arith.constant 0 : index
    %c0_105 = arith.constant 0 : index
    %252 = vector.load %arg6[%c1_103, %c0_104, %c0_105] : memref<2x32x32xf32, #tpu.memory_space<vmem>>, vector<1x32x32xf32>
    %253 = vector.shape_cast %252 : vector<1x32x32xf32> to vector<32x32xf32>
    %cst_106 = arith.constant dense<0.000000e+00> : vector<16x32xf32>
    %254 = tpu.matmul %251, %253, %cst_106 {dimension_numbers = #tpu.dot_dimension_numbers<[1], [0], [0], [1], [0, 0, 1, 1], [], []>} : vector<16x32xf32>, vector<32x32xf32>, vector<16x32xf32> -> vector<16x32xf32>
    %c1_107 = arith.constant 1 : index
    %c0_108 = arith.constant 0 : index
    %c0_109 = arith.constant 0 : index
    %255 = vector.load %arg7[%c1_107, %c0_108, %c0_109] : memref<2x1x32xf32, #tpu.memory_space<vmem>>, vector<1x1x32xf32>
    %256 = vector.shape_cast %255 : vector<1x1x32xf32> to vector<1x32xf32>
    %257 = vector.broadcast %256 : vector<1x32xf32> to vector<16x32xf32>
    %258 = arith.addf %254, %257 : vector<16x32xf32>
    %259 = arith.addf %258, %179 : vector<16x32xf32>
    %c1_110 = arith.constant 1 : index
    %c0_111 = arith.constant 0 : index
    %c0_112 = arith.constant 0 : index
    %260 = vector.load %arg8[%c1_110, %c0_111, %c0_112] : memref<2x1x32xf32, #tpu.memory_space<vmem>>, vector<1x1x32xf32>
    %261 = vector.shape_cast %260 : vector<1x1x32xf32> to vector<1x32xf32>
    %c1_113 = arith.constant 1 : index
    %c0_114 = arith.constant 0 : index
    %c0_115 = arith.constant 0 : index
    %262 = vector.load %arg9[%c1_113, %c0_114, %c0_115] : memref<2x1x32xf32, #tpu.memory_space<vmem>>, vector<1x1x32xf32>
    %263 = vector.shape_cast %262 : vector<1x1x32xf32> to vector<1x32xf32>
    %cst_116 = arith.constant dense<0.000000e+00> : vector<16xf32>
    %264 = vector.multi_reduction <add>, %259, %cst_116 [1] : vector<16x32xf32> to vector<16xf32>
    %265 = vector.shape_cast %264 : vector<16xf32> to vector<16x1xf32>
    %cst_117 = arith.constant 3.200000e+01 : f32
    %266 = vector.broadcast %cst_117 : f32 to vector<16x1xf32>
    %267 = arith.divf %265, %266 : vector<16x1xf32>
    %268 = vector.broadcast %267 : vector<16x1xf32> to vector<16x32xf32>
    %269 = arith.subf %259, %268 : vector<16x32xf32>
    %270 = arith.mulf %269, %269 : vector<16x32xf32>
    %cst_118 = arith.constant dense<0.000000e+00> : vector<16xf32>
    %271 = vector.multi_reduction <add>, %270, %cst_118 [1] : vector<16x32xf32> to vector<16xf32>
    %272 = vector.shape_cast %271 : vector<16xf32> to vector<16x1xf32>
    %cst_119 = arith.constant 3.200000e+01 : f32
    %273 = vector.broadcast %cst_119 : f32 to vector<16x1xf32>
    %274 = arith.divf %272, %273 : vector<16x1xf32>
    %cst_120 = arith.constant 9.99999996E-13 : f32
    %275 = vector.broadcast %cst_120 : f32 to vector<16x1xf32>
    %276 = arith.addf %274, %275 : vector<16x1xf32>
    %277 = math.rsqrt %276 : vector<16x1xf32>
    %278 = vector.broadcast %277 : vector<16x1xf32> to vector<16x32xf32>
    %279 = arith.mulf %269, %278 : vector<16x32xf32>
    %280 = vector.broadcast %261 : vector<1x32xf32> to vector<16x32xf32>
    %281 = arith.mulf %279, %280 : vector<16x32xf32>
    %282 = vector.broadcast %263 : vector<1x32xf32> to vector<16x32xf32>
    %283 = arith.addf %281, %282 : vector<16x32xf32>
    %c1_121 = arith.constant 1 : index
    %c0_122 = arith.constant 0 : index
    %c0_123 = arith.constant 0 : index
    %284 = vector.load %arg10[%c1_121, %c0_122, %c0_123] : memref<2x32x64xf32, #tpu.memory_space<vmem>>, vector<1x32x64xf32>
    %285 = vector.shape_cast %284 : vector<1x32x64xf32> to vector<32x64xf32>
    %cst_124 = arith.constant dense<0.000000e+00> : vector<16x64xf32>
    %286 = tpu.matmul %283, %285, %cst_124 {dimension_numbers = #tpu.dot_dimension_numbers<[1], [0], [0], [1], [0, 0, 1, 1], [], []>} : vector<16x32xf32>, vector<32x64xf32>, vector<16x64xf32> -> vector<16x64xf32>
    %c1_125 = arith.constant 1 : index
    %c0_126 = arith.constant 0 : index
    %c0_127 = arith.constant 0 : index
    %287 = vector.load %arg11[%c1_125, %c0_126, %c0_127] : memref<2x1x64xf32, #tpu.memory_space<vmem>>, vector<1x1x64xf32>
    %288 = vector.shape_cast %287 : vector<1x1x64xf32> to vector<1x64xf32>
    %289 = vector.broadcast %288 : vector<1x64xf32> to vector<16x64xf32>
    %290 = arith.addf %286, %289 : vector<16x64xf32>
    %291 = arith.mulf %290, %290 : vector<16x64xf32>
    %292 = arith.mulf %290, %291 : vector<16x64xf32>
    %cst_128 = arith.constant 4.471500e-02 : f32
    %293 = vector.broadcast %cst_128 : f32 to vector<16x64xf32>
    %294 = arith.mulf %293, %292 : vector<16x64xf32>
    %295 = arith.addf %290, %294 : vector<16x64xf32>
    %cst_129 = arith.constant 0.797884583 : f32
    %296 = vector.broadcast %cst_129 : f32 to vector<16x64xf32>
    %297 = arith.mulf %296, %295 : vector<16x64xf32>
    %298 = math.tanh %297 : vector<16x64xf32>
    %cst_130 = arith.constant 1.000000e+00 : f32
    %299 = vector.broadcast %cst_130 : f32 to vector<16x64xf32>
    %300 = arith.addf %299, %298 : vector<16x64xf32>
    %cst_131 = arith.constant 5.000000e-01 : f32
    %301 = vector.broadcast %cst_131 : f32 to vector<16x64xf32>
    %302 = arith.mulf %301, %300 : vector<16x64xf32>
    %303 = arith.mulf %290, %302 : vector<16x64xf32>
    %c1_132 = arith.constant 1 : index
    %c0_133 = arith.constant 0 : index
    %c0_134 = arith.constant 0 : index
    %304 = vector.load %arg12[%c1_132, %c0_133, %c0_134] : memref<2x64x32xf32, #tpu.memory_space<vmem>>, vector<1x64x32xf32>
    %305 = vector.shape_cast %304 : vector<1x64x32xf32> to vector<64x32xf32>
    %cst_135 = arith.constant dense<0.000000e+00> : vector<16x32xf32>
    %306 = tpu.matmul %303, %305, %cst_135 {dimension_numbers = #tpu.dot_dimension_numbers<[1], [0], [0], [1], [0, 0, 1, 1], [], []>} : vector<16x64xf32>, vector<64x32xf32>, vector<16x32xf32> -> vector<16x32xf32>
    %c1_136 = arith.constant 1 : index
    %c0_137 = arith.constant 0 : index
    %c0_138 = arith.constant 0 : index
    %307 = vector.load %arg13[%c1_136, %c0_137, %c0_138] : memref<2x1x32xf32, #tpu.memory_space<vmem>>, vector<1x1x32xf32>
    %308 = vector.shape_cast %307 : vector<1x1x32xf32> to vector<1x32xf32>
    %309 = vector.broadcast %308 : vector<1x32xf32> to vector<16x32xf32>
    %310 = arith.addf %306, %309 : vector<16x32xf32>
    %311 = arith.addf %310, %283 : vector<16x32xf32>
    %c1_139 = arith.constant 1 : index
    %c0_140 = arith.constant 0 : index
    %c0_141 = arith.constant 0 : index
    %312 = vector.load %arg14[%c1_139, %c0_140, %c0_141] : memref<2x1x32xf32, #tpu.memory_space<vmem>>, vector<1x1x32xf32>
    %313 = vector.shape_cast %312 : vector<1x1x32xf32> to vector<1x32xf32>
    %c1_142 = arith.constant 1 : index
    %c0_143 = arith.constant 0 : index
    %c0_144 = arith.constant 0 : index
    %314 = vector.load %arg15[%c1_142, %c0_143, %c0_144] : memref<2x1x32xf32, #tpu.memory_space<vmem>>, vector<1x1x32xf32>
    %315 = vector.shape_cast %314 : vector<1x1x32xf32> to vector<1x32xf32>
    %cst_145 = arith.constant dense<0.000000e+00> : vector<16xf32>
    %316 = vector.multi_reduction <add>, %311, %cst_145 [1] : vector<16x32xf32> to vector<16xf32>
    %317 = vector.shape_cast %316 : vector<16xf32> to vector<16x1xf32>
    %cst_146 = arith.constant 3.200000e+01 : f32
    %318 = vector.broadcast %cst_146 : f32 to vector<16x1xf32>
    %319 = arith.divf %317, %318 : vector<16x1xf32>
    %320 = vector.broadcast %319 : vector<16x1xf32> to vector<16x32xf32>
    %321 = arith.subf %311, %320 : vector<16x32xf32>
    %322 = arith.mulf %321, %321 : vector<16x32xf32>
    %cst_147 = arith.constant dense<0.000000e+00> : vector<16xf32>
    %323 = vector.multi_reduction <add>, %322, %cst_147 [1] : vector<16x32xf32> to vector<16xf32>
    %324 = vector.shape_cast %323 : vector<16xf32> to vector<16x1xf32>
    %cst_148 = arith.constant 3.200000e+01 : f32
    %325 = vector.broadcast %cst_148 : f32 to vector<16x1xf32>
    %326 = arith.divf %324, %325 : vector<16x1xf32>
    %cst_149 = arith.constant 9.99999996E-13 : f32
    %327 = vector.broadcast %cst_149 : f32 to vector<16x1xf32>
    %328 = arith.addf %326, %327 : vector<16x1xf32>
    %329 = math.rsqrt %328 : vector<16x1xf32>
    %330 = vector.broadcast %329 : vector<16x1xf32> to vector<16x32xf32>
    %331 = arith.mulf %321, %330 : vector<16x32xf32>
    %332 = vector.broadcast %313 : vector<1x32xf32> to vector<16x32xf32>
    %333 = arith.mulf %331, %332 : vector<16x32xf32>
    %334 = vector.broadcast %315 : vector<1x32xf32> to vector<16x32xf32>
    %335 = arith.addf %333, %334 : vector<16x32xf32>
    %336 = vector.extract_strided_slice %335 {offsets = [0, 0], sizes = [1, 32], strides = [1, 1]} : vector<16x32xf32> to vector<1x32xf32>
    %337 = vector.extract_strided_slice %335 {offsets = [8, 0], sizes = [1, 32], strides = [1, 1]} : vector<16x32xf32> to vector<1x32xf32>
    %338 = tpu.concatenate %336, %337 in 0 : vector<1x32xf32>, vector<1x32xf32> -> vector<2x32xf32>
    %c0_150 = arith.constant 0 : index
    %c0_151 = arith.constant 0 : index
    %339 = vector.load %arg16[%c0_150, %c0_151] : memref<32x32xf32, #tpu.memory_space<vmem>>, vector<32x32xf32>
    %cst_152 = arith.constant dense<0.000000e+00> : vector<2x32xf32>
    %340 = tpu.matmul %338, %339, %cst_152 {dimension_numbers = #tpu.dot_dimension_numbers<[1], [0], [0], [1], [0, 0, 1, 1], [], []>} : vector<2x32xf32>, vector<32x32xf32>, vector<2x32xf32> -> vector<2x32xf32>
    %c0_153 = arith.constant 0 : index
    %c0_154 = arith.constant 0 : index
    %341 = vector.load %arg17[%c0_153, %c0_154] : memref<1x32xf32, #tpu.memory_space<vmem>>, vector<1x32xf32>
    %342 = vector.broadcast %341 : vector<1x32xf32> to vector<2x32xf32>
    %343 = arith.addf %340, %342 : vector<2x32xf32>
    %344 = math.tanh %343 : vector<2x32xf32>
    %c0_155 = arith.constant 0 : index
    %c0_156 = arith.constant 0 : index
    %345 = vector.load %arg18[%c0_155, %c0_156] : memref<32x12xf32, #tpu.memory_space<vmem>>, vector<32x12xf32>
    %cst_157 = arith.constant dense<0.000000e+00> : vector<2x12xf32>
    %346 = tpu.matmul %344, %345, %cst_157 {dimension_numbers = #tpu.dot_dimension_numbers<[1], [0], [0], [1], [0, 0, 1, 1], [], []>} : vector<2x32xf32>, vector<32x12xf32>, vector<2x12xf32> -> vector<2x12xf32>
    %c0_158 = arith.constant 0 : index
    %c0_159 = arith.constant 0 : index
    %347 = vector.load %arg19[%c0_158, %c0_159] : memref<1x12xf32, #tpu.memory_space<vmem>>, vector<1x12xf32>
    %348 = vector.broadcast %347 : vector<1x12xf32> to vector<2x12xf32>
    %349 = arith.addf %346, %348 : vector<2x12xf32>
    %c0_160 = arith.constant 0 : index
    %c0_161 = arith.constant 0 : index
    %350 = vector.load %arg20[%c0_160, %c0_161] : memref<2x12xf32, #tpu.memory_space<vmem>>, vector<2x12xf32>
    tpu.vector_store %arg20[%c0_160, %c0_161], %349 {strides = array<i32>} : memref<2x12xf32, #tpu.memory_space<vmem>>, vector<2x12xf32>,
    return
  }
}

</mosaic_0001>

<bundles_post_ra>
// kernel: text_classifier_forward.1
= control target key start
LH: loop header
LB: loop body
LE: loop exit
PB: predicated region body
PF: predicated region fallthrough
CT: control target
= control target key end

     0   :  { %s4469_s0 = inlined_call_operand.vmem [shape: f32[16,32], index: 0, kind: input, shape index: {}]   ;;  %s4470_s1 = inlined_call_operand.vmem [shape: f32[16,16], index: 1, kind: input, shape index: {}]   ;;  %s4471_s2 = inlined_call_operand.vmem [shape: f32[1,32], index: 2, kind: input, shape index: {}]   ;;  %s4472_s3 = inlined_call_operand.vmem [shape: f32[1,32], index: 3, kind: input, shape index: {}]   ;;  %s4473_s4 = inlined_call_operand.vmem [shape: f32[2,32,96], index: 4, kind: input, shape index: {}]   ;;  %s4474_s5 = inlined_call_operand.vmem [shape: f32[2,1,96], index: 5, kind: input, shape index: {}]   ;;  %s4475_s6 = inlined_call_operand.vmem [shape: f32[2,32,32], index: 6, kind: input, shape index: {}]   ;;  %s4476_s7 = inlined_call_operand.vmem [shape: f32[2,1,32], index: 7, kind: input, shape index: {}]   ;;  %s4477_s8 = inlined_call_operand.vmem [shape: f32[2,1,32], index: 8, kind: input, shape index: {}]   ;;  %s4478_s9 = inlined_call_operand.vmem [shape: f32[2,1,32], index: 9, kind: input, shape index: {}]   ;;  %s4479_s10 = inlined_call_operand.vmem [shape: f32[2,32,64], index: 10, kind: input, shape index: {}]   ;;  %s4480_s11 = inlined_call_operand.vmem [shape: f32[2,1,64], index: 11, kind: input, shape index: {}]   ;;  %s4481_s12 = inlined_call_operand.vmem [shape: f32[2,64,32], index: 12, kind: input, shape index: {}]   ;;  %s4482_s13 = inlined_call_operand.vmem [shape: f32[2,1,32], index: 13, kind: input, shape index: {}]   ;;  %s4483_s14 = inlined_call_operand.vmem [shape: f32[2,1,32], index: 14, kind: input, shape index: {}]   ;;  %s4484_s15 = inlined_call_operand.vmem [shape: f32[2,1,32], index: 15, kind: input, shape index: {}]   ;;  %s4485_s16 = inlined_call_operand.vmem [shape: f32[32,32], index: 16, kind: input, shape index: {}]   ;;  %s4486_s17 = inlined_call_operand.vmem [shape: f32[1,32], index: 17, kind: input, shape index: {}]   ;;  %s4487_s18 = inlined_call_operand.vmem [shape: f32[32,12], index: 18, kind: input, shape index: {}]   ;;  %s4488_s19 = inlined_call_operand.vmem [shape: f32[1,12], index: 19, kind: input, shape index: {}]   ;;  %s4489_s20 = inlined_call_operand.hbm [shape: f32[2,12], index: 20, kind: output, shape index: {}]  }
   0x1   :  { %4507 = sst [smem:[#allocation5_spill]] %s4469_s0 }
   0x2   :  { %4508 = sst [smem:[#allocation6_spill]] %s4470_s1 }
   0x3   :  { %4509 = sst [smem:[#allocation7_spill]] %s4471_s2 }
   0x4   :  { %4510 = sst [smem:[#allocation8_spill]] %s4472_s3 }
   0x5   :  { %4511 = sst [smem:[#allocation9_spill]] %s4473_s4 }
   0x6   :  { %s4512_s23 = sld [smem:[#allocation5_spill]]  ;;  %vm70_vm0 = vcmask 261120  }
   0xc   :  { %v66_v0 = vld [vmem:[%s4512_s23] sm:$0xff]  ;;  %v67_v1 = vld [vmem:[%s4512_s23 + $0x8] sm:$0xff] }
   0xd   :  { %25 = vsyncpa [#allocation3], 0  ;;  %v71_v2 = vsel %vm70_vm0, %v66_v0, 0.0  ;;  %v74_v3 = vsel %vm70_vm0, %v67_v1, 0.0  ;;  %s4513_s26 = sld [smem:[#allocation9_spill]]  ;;  %s4514_s22 = sld [smem:[#allocation7_spill]] }
   0xe   :  { %72 = vadd.xlane.f32.xlu0 %v71_v2  ;;  %s4515_s2 = sld [smem:[#allocation8_spill]]  ;;  %v2944_v36 = vld [vmem:[%s4474_s5] ss:$0 sm:$0xff]  ;;  %vm214_vm1 = vcmask 64512   ;;  %s3814_s27 = smov 88   ;;  %vm298_vm3 = vcmask 130048  }
   0xf   :  { %s3815_s28 = smov 96   ;;  %s3816_s4 = smov 120   ;;  %vm3996_vm2 = vmpackc.low %vm214_vm1, %vm214_vm1  ;;  %vm1036_vm4 = vcmask 195584   ;;  %vm1302_vm5 = vcmask 523264   ;;  %vm3829_vm6 = vmmov 0   ;;  %vm2755_vm7 = vcmask 1040384  }
  0x10   :  { %s4518_s0 = sld [smem:[#allocation6_spill]]  ;;  %s3818_s23 = smov 64   ;;  %vm2926_vm8 = vcmask 91136  }
  0x11   :  { %s4504_s24 = smov 80   ;;  %s4501_s25 = smov 48  }
  0x12   :  { %75 = vadd.xlane.f32.xlu0 %v74_v3  ;;  %s4497_s3 = smov 104   ;;  %s4496_s29 = smov 72  }
  0x13   :  { %v116_v14 = vld [vmem:[%s4513_s26] sm:$0xff]  ;;  %v117_v15 = vld [vmem:[%s4513_s26 + $0x8] sm:$0xff]  ;;  %v118_v16 = vld [vmem:[%s4513_s26 + $0x10] sm:$0xff]  ;;  %s4495_s30 = smov 40   ;;  %s4499_s21 = smov 8  }
  0x14   :  { %v3424_v17 = vpack.c.bf16 %v117_v15, %v116_v14  ;;  %v119_v18 = vld [vmem:[%s4513_s26 + $0x18] sm:$0xff]  ;;  %v2942_v27 = vld [vmem:[%s4514_s22] ss:$0 sm:$0xff]  ;;  %s3817_s22 = smov 56   ;;  %s4493_s1 = smov 16  }
  0x15   :  { %v3428_v19 = vpack.c.bf16 %v119_v18, %v118_v16  ;;  %v2943_v29 = vld [vmem:[%s4515_s2] ss:$0 sm:$0xff]  ;;  %s4502_s2 = smov 112  }
  0x16   :  { %3425 = vmatprep.subr.bf16.mxu0 %v3424_v17  ;;  %v4015_v53 = vld [vmem:[%s4518_s0 + $0x8] sm:$0xff]  ;;  %v4020_v54 = vld [vmem:[%s4518_s0] sm:$0xff] }
  0x17   :  { %3427 = vmatpush3.bf16.msra.mxu0 %v3424_v17 }
  0x18   :  { %3429 = vmatprep.subr.bf16.mxu0 %v3428_v19 }
  0x1b   :  { %3431 = vmatpush3.bf16.msra.mxu0 %v3428_v19 }
  0x9b   :  { %v73_v4 = vpop.xlane.xlu0 %72 }
  0x9c   :  { %v78_v5 = vmul.f32 0.03125, %v73_v4 }
  0x9e   :  { %v80_v6 = vsub.f32 %v66_v0, %v78_v5 }
  0x9f   :  { %v76_v7 = vpop.xlane.xlu0 %75 }
  0xa0   :  { %v79_v8 = vmul.f32 0.03125, %v76_v7  ;;  %v82_v9 = vmul.f32 %v80_v6, %v80_v6 }
  0xa2   :  { %v81_v10 = vsub.f32 %v67_v1, %v79_v8  ;;  %v84_v11 = vsel %vm70_vm0, %v82_v9, 0.0 }
  0xa3   :  { %85 = vadd.xlane.f32.xlu1 %v84_v11 }
  0xa4   :  { %v83_v12 = vmul.f32 %v81_v10, %v81_v10 }
  0xa6   :  { %v87_v13 = vsel %vm70_vm0, %v83_v12, 0.0 }
  0xa7   :  { %88 = vadd.xlane.f32.xlu1 %v87_v13 }
 0x130   :  { %v86_v20 = vpop.xlane.xlu1 %85 }
 0x131   :  { %v90_v21 = vmul.f32 0.03125, %v86_v20 }
 0x133   :  { %v92_v22 = vadd.f32 1e-12, %v90_v21 }
 0x134   :  { %v89_v23 = vpop.xlane.xlu1 %88 }
 0x135   :  { %3694 = vrsqrt.f32 %v92_v22  ;;  %v91_v24 = vmul.f32 0.03125, %v89_v23 }
 0x137   :  { %v93_v25 = vadd.f32 1e-12, %v91_v24 }
 0x139   :  { %3696 = vrsqrt.f32 %v93_v25 }
 0x13f   :  { %v3695_v26 = vpop.eup %3694 }
 0x140   :  { %v96_v28 = vmul.f32 %v3695_v26, %v80_v6 }
 0x142   :  { %v104_v30 = vmul.f32 %v2942_v27, %v96_v28 }
 0x143   :  { %v3697_v31 = vpop.eup %3696 }
 0x144   :  { %v97_v32 = vmul.f32 %v3697_v31, %v81_v10  ;;  %v3965_v33 = vadd.f32 %v2943_v29, %v104_v30 }
 0x146   :  { %v105_v34 = vmul.f32 %v2942_v27, %v97_v32  ;;  %3194 = vmatprep.mubr.msk.f32.mxu0 %vm70_vm0, %v3965_v33 }
 0x148   :  { %v3969_v35 = vadd.f32 %v2943_v29, %v105_v34 }
 0x14a   :  { %3195 = vmatmul.mubr.msk.f32.vlgmr.msra.gmra.mrb[0].mxu0 %vm70_vm0, %v3969_v35 }
 0x21d   :  { %v3196_v37 = vpop.f32.mrb[0].mxu0 }
 0x21e   :  { %v3976_v38 = vadd.f32 %v3196_v37, %v2944_v36  ;;  %v199_v39 = vpop.f32.mrb[1].mxu0 }
 0x21f   :  { %v3978_v40 = vadd.f32 %v2944_v36, %v199_v39 }
 0x221   :  { %3201 = vmatprep.mubr.msk.f32.mxu1 %vm214_vm1, %v3978_v40  ;;  %v3984_v41 = vpack.i.bf16 %v3976_v38, %v3978_v40 }
 0x223   :  { %3620 = vrot.lane.b32.xlu1 %v3984_v41, %s3814_s27  ;;  %3615 = vrot.lane.b32.xlu0 %v3984_v41, %s3815_s28 }
 0x227   :  { %408 = vrot.lane.b32.xlu1 %v3978_v40, %s3816_s4 }
 0x22b   :  { %410 = vrot.lane.b32.xlu1 %v3976_v38, %s3816_s4 }
 0x295   :  { %v3621_v42 = vpop.permute.xlu1 %3620  ;;  %v3616_v43 = vpop.permute.xlu0 %3615 }
 0x296   :  { %v3623_v44 = vunpack.i.h.bf16 %v3621_v42  ;;  %v3622_v45 = vunpack.i.l.bf16 %v3621_v42  ;;  %v3618_v46 = vunpack.i.h.bf16 %v3616_v43  ;;  %v3617_v47 = vunpack.i.l.bf16 %v3616_v43 }
 0x298   :  { %v3432_v49 = vpack.c.bf16 %v3618_v46, %v3617_v47  ;;  %v3442_v50 = vpack.c.bf16 %v3623_v44, %v3622_v45 }
 0x299   :  { %v409_v51 = vpop.permute.xlu1 %408 }
 0x29a   :  { %3434 = vmatprep.subr.msk.bf16.mxu1 %vm3996_vm2, %v3432_v49 }
 0x29b   :  { %3437 = vmatpush3.bf16.xpose.msk.msra.mxu1 %vm3996_vm2, %v3432_v49 }
 0x29c   :  { %3444 = vmatprep.subr.msk.bf16.mxu1 %vm3996_vm2, %v3442_v50 }
 0x29d   :  { %v411_v52 = vpop.permute.xlu1 %410 }
 0x2a2   :  { %3202 = vmatmul.mubr.msk.f32.vlgmr.msra.gmra.mrb[0].mxu1 %vm214_vm1, %v3976_v38 }
 0x2a3   :  { %3447 = vmatpush3.bf16.xpose.msk.msra.mxu1 %vm3996_vm2, %v3442_v50  ;;  %3215 = vmatprep.mubr.msk.f32.mxu1 %vm214_vm1, %v409_v51 }
 0x2aa   :  { %3216 = vmatmul.mubr.msk.f32.vlgmr.msra.gmra.mrb[2].mxu1 %vm214_vm1, %v411_v52 }
 0x375   :  { %v3203_v55 = vpop.f32.mrb[0].mxu1 }
 0x376   :  { %v295_v56 = vadd.f32 %v3203_v55, %v4015_v53  ;;  %v289_v57 = vpop.f32.mrb[1].mxu1 }
 0x377   :  { %v290_v58 = vadd.f32 %v289_v57, %v4020_v54 }
 0x378   :  { %v302_v59 = vsel %vm298_vm3, %v295_v56, -inf }
 0x379   :  { %303 = vmax.xlane.f32.xlu1 %v302_v59  ;;  %v299_v60 = vsel %vm298_vm3, %v290_v58, -inf }
 0x37a   :  { %300 = vmax.xlane.f32.xlu0 %v299_v60 }
 0x37d   :  { %v3217_v61 = vpop.f32.mrb[2].mxu1 }
 0x37e   :  { %v490_v62 = vpop.f32.mrb[3].mxu1  ;;  %v496_v0 = vadd.f32 %v3217_v61, %v4015_v53 }
 0x37f   :  { %v491_v63 = vadd.f32 %v490_v62, %v4020_v54 }
 0x380   :  { %v502_v2 = vsel %vm298_vm3, %v496_v0, -inf }
 0x381   :  { %v499_v1 = vsel %vm298_vm3, %v491_v63, -inf }
 0x382   :  { %500 = vmax.xlane.f32.xlu0 %v499_v1 }
 0x386   :  { %503 = vmax.xlane.f32.xlu0 %v502_v2 }
 0x406   :  { %v304_v3 = vpop.xlane.xlu1 %303 }
 0x407   :  { %v306_v4 = vsub.f32 %v295_v56, %v304_v3  ;;  %v301_v5 = vpop.xlane.xlu0 %300 }
 0x408   :  { %v305_v6 = vsub.f32 %v290_v58, %v301_v5 }
 0x409   :  { %v309_v7 = vmul.f32 1.442695, %v306_v4 }
 0x40a   :  { %v307_v8 = vmul.f32 1.442695, %v305_v6 }
 0x40b   :  { %3698 = vpow2.f32 %v309_v7 }
 0x40c   :  { %3700 = vpow2.f32 %v307_v8 }
 0x40f   :  { %v501_v9 = vpop.xlane.xlu0 %500 }
 0x410   :  { %v505_v10 = vsub.f32 %v491_v63, %v501_v9 }
 0x412   :  { %v507_v11 = vmul.f32 1.442695, %v505_v10 }
 0x413   :  { %v504_v12 = vpop.xlane.xlu0 %503 }
 0x414   :  { %3702 = vpow2.f32 %v507_v11  ;;  %v506_v13 = vsub.f32 %v496_v0, %v504_v12 }
 0x415   :  { %v3699_v14 = vpop.eup %3698 }
 0x416   :  { %v3701_v15 = vpop.eup %3700  ;;  %v509_v16 = vmul.f32 1.442695, %v506_v13  ;;  %v314_v17 = vsel %vm298_vm3, %v3699_v14, 0.0 }
 0x417   :  { %315 = vadd.xlane.f32.xlu1 %v314_v17  ;;  %v311_v18 = vsel %vm298_vm3, %v3701_v15, 0.0 }
 0x418   :  { %3704 = vpow2.f32 %v509_v16  ;;  %312 = vadd.xlane.f32.xlu0 %v311_v18 }
 0x41e   :  { %v3703_v19 = vpop.eup %3702 }
 0x41f   :  { %v511_v20 = vsel %vm298_vm3, %v3703_v19, 0.0 }
 0x420   :  { %512 = vadd.xlane.f32.xlu0 %v511_v20 }
 0x422   :  { %v3705_v21 = vpop.eup %3704 }
 0x423   :  { %v514_v22 = vsel %vm298_vm3, %v3705_v21, 0.0 }
 0x424   :  { %515 = vadd.xlane.f32.xlu1 %v514_v22 }
 0x435   :  { %3630 = vrot.lane.b32.xlu1 %v3984_v41, %s3817_s22 }
 0x436   :  { %3625 = vrot.lane.b32.xlu0 %v3984_v41, %s3818_s23 }
 0x439   :  { %3635 = vrot.lane.b32.xlu1 %v3984_v41, %s4504_s24  ;;  %s4522_s24 = smov 104  }
 0x43a   :  { %610 = vrot.lane.b32.xlu0 %v3976_v38, %s4502_s2 }
 0x43d   :  { %608 = vrot.lane.b32.xlu1 %v3978_v40, %s4502_s2  ;;  %s4524_s2 = smov 40  }
 0x4a4   :  { %v316_v24 = vpop.xlane.xlu1 %315 }
 0x4a5   :  { %v313_v23 = vpop.xlane.xlu0 %312 }
 0x4a6   :  { %3706 = vrcp.f32 %v313_v23 }
 0x4a7   :  { %3708 = vrcp.f32 %v316_v24 }
 0x4ad   :  { %v513_v25 = vpop.xlane.xlu0 %512 }
 0x4ae   :  { %3710 = vrcp.f32 %v513_v25 }
 0x4b0   :  { %v3707_v26 = vpop.eup %3706 }
 0x4b1   :  { %v516_v27 = vpop.xlane.xlu1 %515  ;;  %v3626_v28 = vpop.permute.xlu0 %3625  ;;  %v319_v29 = vmul.f32 %v3707_v26, %v3701_v15 }
 0x4b2   :  { %3712 = vrcp.f32 %v516_v27  ;;  %v3628_v30 = vunpack.i.h.bf16 %v3626_v28  ;;  %v3627_v31 = vunpack.i.l.bf16 %v3626_v28  ;;  %v3709_v34 = vpop.eup %3708 }
 0x4b3   :  { %3208 = vmatprep.mubr.msk.f32.mxu0 %vm298_vm3, %v319_v29  ;;  %v320_v43 = vmul.f32 %v3709_v34, %v3699_v14 }
 0x4b4   :  { %v3438_v32 = vpack.c.bf16 %v3628_v30, %v3627_v31 }
 0x4b5   :  { %v3631_v36 = vpop.permute.xlu1 %3630  ;;  %v611_v56 = vpop.permute.xlu0 %610 }
 0x4b6   :  { %v3633_v37 = vunpack.i.h.bf16 %v3631_v36  ;;  %v3632_v39 = vunpack.i.l.bf16 %v3631_v36  ;;  %3439 = vmatprep.subr.bf16.mxu0 %v3438_v32 }
 0x4b7   :  { %3441 = vmatpush3.bf16.msra.mxu0 %v3438_v32 }
 0x4b8   :  { %v3711_v42 = vpop.eup %3710  ;;  %v3448_v44 = vpack.c.bf16 %v3633_v37, %v3632_v39 }
 0x4b9   :  { %v3636_v45 = vpop.permute.xlu1 %3635  ;;  %v519_v46 = vmul.f32 %v3711_v42, %v3703_v19 }
 0x4ba   :  { %v3638_v47 = vunpack.i.h.bf16 %v3636_v45  ;;  %v3637_v49 = vunpack.i.l.bf16 %v3636_v45  ;;  %3209 = vmatmul.mubr.msk.f32.vlgmr.msra.gmra.mrb[2].mxu0 %vm298_vm3, %v320_v43  ;;  %3449 = vmatprep.subr.bf16.mxu0 %v3448_v44 }
 0x4bb   :  { %3451 = vmatpush3.bf16.msra.mxu0 %v3448_v44  ;;  %3222 = vmatprep.mubr.msk.f32.mxu0 %vm298_vm3, %v519_v46 }
 0x4bc   :  { %v3713_v50 = vpop.eup %3712  ;;  %v3452_v51 = vpack.c.bf16 %v3638_v47, %v3637_v49 }
 0x4bd   :  { %v520_v52 = vmul.f32 %v3713_v50, %v3705_v21  ;;  %v609_v55 = vpop.permute.xlu1 %608 }
 0x4be   :  { %3454 = vmatprep.subr.msk.bf16.mxu0 %vm3996_vm2, %v3452_v51 }
 0x4bf   :  { %3223 = vmatmul.mubr.msk.f32.vlgmr.msra.gmra.mrb[4].mxu0 %vm298_vm3, %v520_v52 }
 0x4c0   :  { %3229 = vmatprep.mubr.msk.f32.mxu0 %vm214_vm1, %v609_v55 }
 0x4c4   :  { %3457 = vmatpush3.bf16.xpose.msk.msra.mxu0 %vm3996_vm2, %v3452_v51 }
 0x4cb   :  { %3230 = vmatmul.mubr.msk.f32.vlgmr.msra.gmra.mrb[6].mxu0 %vm214_vm1, %v611_v56 }
 0x58d   :  { %v4054_v57 = vpop.f32.mrb[2].mxu0 }
 0x58e   :  { %v4056_v58 = vpop.f32.mrb[3].mxu0 }
 0x592   :  { %v4058_v59 = vpop.f32.mrb[4].mxu0 }
 0x593   :  { %v4060_v60 = vpop.f32.mrb[5].mxu0 }
 0x59e   :  { %v3231_v61 = vpop.f32.mrb[6].mxu0 }
 0x59f   :  { %v696_v62 = vadd.f32 %v3231_v61, %v4015_v53  ;;  %v690_v63 = vpop.f32.mrb[7].mxu0 }
 0x5a0   :  { %v691_v0 = vadd.f32 %v690_v63, %v4020_v54 }
 0x5a1   :  { %v702_v1 = vsel %vm298_vm3, %v696_v62, -inf }
 0x5a2   :  { %703 = vmax.xlane.f32.xlu0 %v702_v1  ;;  %v699_v2 = vsel %vm298_vm3, %v691_v0, -inf  ;;  %v1039_v1 = vld [vmem:[%s4475_s6] sm:$0xff] }
 0x5a3   :  { %700 = vmax.xlane.f32.xlu1 %v699_v2  ;;  %v1041_v2 = vld [vmem:[%s4475_s6 + $0x10] sm:$0xff] }
 0x5b4   :  { %3640 = vrot.lane.b32.xlu1 %v3984_v41, %s4501_s25  ;;  %s4525_s25 = smov 8  }
 0x5b8   :  { %808 = vrot.lane.b32.xlu1 %v3978_v40, %s4497_s3 }
 0x5bc   :  { %810 = vrot.lane.b32.xlu1 %v3976_v38, %s4497_s3  ;;  %s4526_s3 = smov 16  }
 0x62f   :  { %v704_v3 = vpop.xlane.xlu0 %703 }
 0x630   :  { %v706_v4 = vsub.f32 %v696_v62, %v704_v3  ;;  %v701_v5 = vpop.xlane.xlu1 %700 }
 0x631   :  { %v705_v6 = vsub.f32 %v691_v0, %v701_v5 }
 0x632   :  { %v709_v7 = vmul.f32 1.442695, %v706_v4  ;;  %v1042_v4 = vld [vmem:[%s4475_s6 + $0x18] sm:$0xff] }
 0x633   :  { %v707_v8 = vmul.f32 1.442695, %v705_v6  ;;  %v3476_v5 = vpack.c.bf16 %v1042_v4, %v1041_v2  ;;  %v1290_v4 = vld [vmem:[%s4481_s12 + $0x18] sm:$0xff] }
 0x634   :  { %3714 = vpow2.f32 %v709_v7  ;;  %v3641_v9 = vpop.permute.xlu1 %3640 }
 0x635   :  { %v3643_v10 = vunpack.i.h.bf16 %v3641_v9  ;;  %v3642_v11 = vunpack.i.l.bf16 %v3641_v9  ;;  %3716 = vpow2.f32 %v707_v8 }
 0x637   :  { %v3458_v12 = vpack.c.bf16 %v3643_v10, %v3642_v11 }
 0x638   :  { %v809_v25 = vpop.permute.xlu1 %808 }
 0x639   :  { %3459 = vmatprep.subr.bf16.mxu1 %v3458_v12 }
 0x63a   :  { %3461 = vmatpush3.bf16.msra.mxu1 %v3458_v12 }
 0x63c   :  { %v811_v26 = vpop.permute.xlu1 %810 }
 0x63e   :  { %v3715_v13 = vpop.eup %3714 }
 0x63f   :  { %v714_v40 = vsel %vm298_vm3, %v3715_v13, 0.0  ;;  %v3717_v14 = vpop.eup %3716 }
 0x640   :  { %715 = vadd.xlane.f32.xlu0 %v714_v40  ;;  %v711_v38 = vsel %vm298_vm3, %v3717_v14, 0.0 }
 0x644   :  { %712 = vadd.xlane.f32.xlu0 %v711_v38 }
 0x65a   :  { %3645 = vrot.lane.b32.xlu0 %v3984_v41, %s4496_s29 }
 0x6cd   :  { %v716_v15 = vpop.xlane.xlu0 %715 }
 0x6ce   :  { %3718 = vrcp.f32 %v716_v15 }
 0x6d1   :  { %v713_v16 = vpop.xlane.xlu0 %712 }
 0x6d2   :  { %3720 = vrcp.f32 %v713_v16 }
 0x6d5   :  { %v3646_v17 = vpop.permute.xlu0 %3645 }
 0x6d6   :  { %v3648_v18 = vunpack.i.h.bf16 %v3646_v17  ;;  %v3647_v19 = vunpack.i.l.bf16 %v3646_v17 }
 0x6d8   :  { %v3462_v20 = vpack.c.bf16 %v3648_v18, %v3647_v19  ;;  %v3719_v21 = vpop.eup %3718 }
 0x6d9   :  { %v720_v24 = vmul.f32 %v3719_v21, %v3715_v13 }
 0x6da   :  { %3464 = vmatprep.subr.msk.bf16.mxu1 %vm3996_vm2, %v3462_v20 }
 0x6dc   :  { %v3721_v22 = vpop.eup %3720 }
 0x6dd   :  { %v719_v23 = vmul.f32 %v3721_v22, %v3717_v14 }
 0x6df   :  { %3236 = vmatprep.mubr.msk.f32.mxu1 %vm298_vm3, %v719_v23 }
 0x6e0   :  { %3237 = vmatmul.mubr.msk.f32.vlgmr.msra.gmra.mrb[4].mxu1 %vm298_vm3, %v720_v24 }
 0x6e1   :  { %3467 = vmatpush3.bf16.xpose.msk.msra.mxu1 %vm3996_vm2, %v3462_v20  ;;  %3243 = vmatprep.mubr.msk.f32.mxu1 %vm214_vm1, %v809_v25 }
 0x6e8   :  { %3244 = vmatmul.mubr.msk.f32.vlgmr.msra.gmra.mrb[6].mxu1 %vm214_vm1, %v811_v26 }
 0x7b3   :  { %v3238_v27 = vpop.f32.mrb[4].mxu1 }
 0x7b4   :  { %v799_v28 = vpop.f32.mrb[5].mxu1 }
 0x7bb   :  { %v3245_v29 = vpop.f32.mrb[6].mxu1 }
 0x7bc   :  { %v896_v30 = vadd.f32 %v3245_v29, %v4015_v53  ;;  %v890_v31 = vpop.f32.mrb[7].mxu1 }
 0x7bd   :  { %v891_v32 = vadd.f32 %v890_v31, %v4020_v54 }
 0x7be   :  { %v902_v34 = vsel %vm298_vm3, %v896_v30, -inf }
 0x7bf   :  { %903 = vmax.xlane.f32.xlu0 %v902_v34  ;;  %v899_v36 = vsel %vm298_vm3, %v891_v32, -inf }
 0x7c0   :  { %900 = vmax.xlane.f32.xlu1 %v899_v36  ;;  %v1178_v36 = vld [vmem:[%s4479_s10 + $0x8] sm:$0xff] }
 0x7d1   :  { %3650 = vrot.lane.b32.xlu1 %v3984_v41, %s4495_s30  ;;  %s4505_s30 = smov 24  }
 0x7d5   :  { %1012 = vrot.lane.b32.xlu1 %v4058_v59, %s4499_s21 }
 0x7d9   :  { %1018 = vrot.lane.b32.xlu1 %v799_v28, %s4493_s1 }
 0x7dd   :  { %1020 = vrot.lane.b32.xlu1 %v3238_v27, %s4493_s1  ;;  %s4521_s1 = smov 48  }
 0x84c   :  { %v904_v37 = vpop.xlane.xlu0 %903 }
 0x84d   :  { %v906_v39 = vsub.f32 %v896_v30, %v904_v37  ;;  %v901_v42 = vpop.xlane.xlu1 %900 }
 0x84e   :  { %v905_v43 = vsub.f32 %v891_v32, %v901_v42  ;;  %v1180_v42 = vld [vmem:[%s4479_s10 + $0x18] sm:$0xff] }
 0x84f   :  { %v909_v44 = vmul.f32 1.442695, %v906_v39  ;;  %v1179_v39 = vld [vmem:[%s4479_s10 + $0x10] sm:$0xff] }
 0x850   :  { %v907_v45 = vmul.f32 1.442695, %v905_v43  ;;  %v3484_v43 = vpack.c.bf16 %v1180_v42, %v1179_v39 }
 0x851   :  { %v3651_v46 = vpop.permute.xlu1 %3650 }
 0x852   :  { %3722 = vpow2.f32 %v907_v45  ;;  %v3653_v47 = vunpack.i.h.bf16 %v3651_v46  ;;  %v3652_v49 = vunpack.i.l.bf16 %v3651_v46 }
 0x853   :  { %3724 = vpow2.f32 %v909_v44 }
 0x854   :  { %v3468_v41 = vpack.c.bf16 %v3653_v47, %v3652_v49 }
 0x855   :  { %v1013_v8 = vpop.permute.xlu1 %1012 }
 0x856   :  { %3469 = vmatprep.subr.bf16.mxu0 %v3468_v41  ;;  %v1033_v40 = vsel %vm214_vm1, %v4054_v57, %v1013_v8 }
 0x857   :  { %3471 = vmatpush3.bf16.msra.mxu0 %v3468_v41 }
 0x859   :  { %v1019_v9 = vpop.permute.xlu1 %1018 }
 0x85c   :  { %v3723_v50 = vpop.eup %3722 }
 0x85d   :  { %v911_v51 = vsel %vm298_vm3, %v3723_v50, 0.0  ;;  %v3725_v52 = vpop.eup %3724  ;;  %v1021_v11 = vpop.permute.xlu1 %1020 }
 0x85e   :  { %912 = vadd.xlane.f32.xlu0 %v911_v51  ;;  %v914_v55 = vsel %vm298_vm3, %v3725_v52, 0.0  ;;  %v1035_v15 = vsel %vm298_vm3, %v1033_v40, %v1021_v11  ;;  %v2974_v51 = vld [vmem:[%s4477_s8] ss:$0 sm:$0xff] }
 0x862   :  { %915 = vadd.xlane.f32.xlu0 %v914_v55  ;;  %v2975_v55 = vld [vmem:[%s4478_s9] ss:$0 sm:$0xff] }
 0x878   :  { %1010 = vrot.lane.b32.xlu0 %v4060_v60, %s4499_s21  ;;  %v1040_v60 = vld [vmem:[%s4475_s6 + $0x8] sm:$0xff] }
 0x879   :  { %v3472_v3 = vpack.c.bf16 %v1040_v60, %v1039_v1  ;;  %v1287_v1 = vld [vmem:[%s4481_s12] sm:$0xff]  ;;  %v1288_v60 = vld [vmem:[%s4481_s12 + $0x8] sm:$0xff] }
 0x87a   :  { %v3488_v2 = vpack.c.bf16 %v1288_v60, %v1287_v1 }
 0x87b   :  { %3473 = vmatprep.subr.bf16.mxu0 %v3472_v3 }
 0x8eb   :  { %v913_v56 = vpop.xlane.xlu0 %912 }
 0x8ec   :  { %3726 = vrcp.f32 %v913_v56 }
 0x8ef   :  { %v916_v59 = vpop.xlane.xlu0 %915 }
 0x8f0   :  { %3728 = vrcp.f32 %v916_v59 }
 0x8f3   :  { %v1011_v10 = vpop.permute.xlu0 %1010 }
 0x8f4   :  { %v1032_v12 = vsel %vm214_vm1, %v4056_v58, %v1011_v10  ;;  %v2971_v58 = vld [vmem:[%s4476_s7] ss:$0 sm:$0xff]  ;;  %v1294_v10 = vld [vmem:[%s4481_s12 + $0x38] sm:$0xff] }
 0x8f5   :  { %v1034_v14 = vsel %vm298_vm3, %v1032_v12, %v1019_v9  ;;  %v1293_v9 = vld [vmem:[%s4481_s12 + $0x30] sm:$0xff]  ;;  %v2976_v12 = vld [vmem:[%s4480_s11] ss:$0 sm:$0xff] }
 0x8f6   :  { %v3727_v61 = vpop.eup %3726  ;;  %v3500_v11 = vpack.c.bf16 %v1294_v10, %v1293_v9  ;;  %v2983_v10 = vld [vmem:[%s4484_s15] ss:$0 sm:$0xff] }
 0x8f7   :  { %v919_v62 = vmul.f32 %v3727_v61, %v3723_v50 }
 0x8f9   :  { %3250 = vmatprep.mubr.msk.f32.mxu0 %vm298_vm3, %v919_v62 }
 0x8fa   :  { %v3729_v63 = vpop.eup %3728 }
 0x8fb   :  { %v920_v0 = vmul.f32 %v3729_v63, %v3725_v52 }
 0x8fd   :  { %3251 = vmatmul.mubr.msk.f32.vlgmr.msra.gmra.mrb[8].mxu0 %vm298_vm3, %v920_v0 }
 0x8fe   :  { %3475 = vmatpush3.bf16.msra.mxu0 %v3472_v3  ;;  %v1289_v3 = vld [vmem:[%s4481_s12 + $0x10] sm:$0xff] }
 0x8ff   :  { %3477 = vmatprep.subr.bf16.mxu0 %v3476_v5 }
 0x902   :  { %3479 = vmatpush3.bf16.msra.mxu0 %v3476_v5  ;;  %v3492_v5 = vpack.c.bf16 %v1290_v4, %v1289_v3 }
 0x903   :  { %3489 = vmatprep.subr.bf16.mxu0 %v3488_v2 }
 0x9d0   :  { %v3252_v6 = vpop.f32.mrb[8].mxu0 }
 0x9d1   :  { %1028 = vrot.lane.b32.xlu1 %v3252_v6, %s4505_s30  ;;  %v999_v7 = vpop.f32.mrb[9].mxu0  ;;  %v1291_v6 = vld [vmem:[%s4481_s12 + $0x20] sm:$0xff] }
 0x9d2   :  { %1026 = vrot.lane.b32.xlu0 %v999_v7, %s4505_s30  ;;  %v1292_v7 = vld [vmem:[%s4481_s12 + $0x28] sm:$0xff] }
 0x9d3   :  { %v3496_v8 = vpack.c.bf16 %v1292_v7, %v1291_v6  ;;  %v2982_v6 = vld [vmem:[%s4483_s14] ss:$0 sm:$0xff] }
 0xa43   :  { %v1029_v13 = vpop.permute.xlu1 %1028 }
 0xa44   :  { %v1027_v38 = vpop.permute.xlu0 %1026  ;;  %v1038_v17 = vsel %vm1036_vm4, %v1035_v15, %v1029_v13 }
 0xa45   :  { %v1037_v16 = vsel %vm1036_vm4, %v1034_v14, %v1027_v38 }
 0xa46   :  { %3261 = vmatprep.mubr.msk.f32.mxu0 %vm70_vm0, %v1037_v16 }
 0xa47   :  { %3262 = vmatmul.mubr.msk.f32.vlgmr.msra.gmra.mrb[10].mxu0 %vm70_vm0, %v1038_v17 }
 0xa48   :  { %3491 = vmatpush3.bf16.msra.mxu0 %v3488_v2 }
 0xa49   :  { %3493 = vmatprep.subr.bf16.mxu0 %v3492_v5 }
 0xa4c   :  { %3495 = vmatpush3.bf16.msra.mxu0 %v3492_v5 }
 0xa4d   :  { %3497 = vmatprep.subr.bf16.mxu0 %v3496_v8 }
 0xa50   :  { %3499 = vmatpush3.bf16.msra.mxu0 %v3496_v8 }
 0xa51   :  { %3501 = vmatprep.subr.bf16.mxu0 %v3500_v11 }
 0xa54   :  { %3503 = vmatpush3.bf16.msra.mxu0 %v3500_v11 }
 0xb1a   :  { %v3263_v18 = vpop.f32.mrb[10].mxu0 }
 0xb1b   :  { %v1128_v19 = vadd.f32 %v3263_v18, %v2971_v58  ;;  %v1122_v57 = vpop.f32.mrb[11].mxu0 }
 0xb1c   :  { %v1123_v20 = vadd.f32 %v2971_v58, %v1122_v57 }
 0xb1d   :  { %v1132_v21 = vadd.f32 %v1128_v19, %v3969_v35 }
 0xb1e   :  { %v1131_v22 = vadd.f32 %v1123_v20, %v3965_v33  ;;  %v1177_v33 = vld [vmem:[%s4479_s10] sm:$0xff] }
 0xb1f   :  { %v1138_v23 = vsel %vm70_vm0, %v1132_v21, 0.0  ;;  %v3480_v37 = vpack.c.bf16 %v1178_v36, %v1177_v33 }
 0xb20   :  { %1139 = vadd.xlane.f32.xlu1 %v1138_v23  ;;  %v1135_v24 = vsel %vm70_vm0, %v1131_v22, 0.0 }
 0xb21   :  { %1136 = vadd.xlane.f32.xlu0 %v1135_v24  ;;  %3481 = vmatprep.subr.bf16.mxu1 %v3480_v37 }
 0xb22   :  { %3483 = vmatpush3.bf16.msra.mxu1 %v3480_v37 }
 0xb23   :  { %3485 = vmatprep.subr.bf16.mxu1 %v3484_v43 }
 0xb26   :  { %3487 = vmatpush3.bf16.msra.mxu1 %v3484_v43 }
 0xbad   :  { %v1140_v25 = vpop.xlane.xlu1 %1139 }
 0xbae   :  { %v1142_v26 = vmul.f32 0.03125, %v1140_v25  ;;  %v1137_v27 = vpop.xlane.xlu0 %1136 }
 0xbaf   :  { %v1141_v28 = vmul.f32 0.03125, %v1137_v27 }
 0xbb0   :  { %v1144_v29 = vsub.f32 %v1132_v21, %v1142_v26 }
 0xbb1   :  { %v1143_v30 = vsub.f32 %v1131_v22, %v1141_v28 }
 0xbb2   :  { %v1146_v34 = vmul.f32 %v1144_v29, %v1144_v29 }
 0xbb3   :  { %v1145_v31 = vmul.f32 %v1143_v30, %v1143_v30 }
 0xbb4   :  { %v1150_v35 = vsel %vm70_vm0, %v1146_v34, 0.0 }
 0xbb5   :  { %v1147_v32 = vsel %vm70_vm0, %v1145_v31, 0.0  ;;  %v2979_v31 = vld [vmem:[%s4482_s13] ss:$0 sm:$0xff] }
 0xbb6   :  { %1148 = vadd.xlane.f32.xlu0 %v1147_v32 }
 0xbba   :  { %1151 = vadd.xlane.f32.xlu0 %v1150_v35 }
 0xc43   :  { %v1149_v44 = vpop.xlane.xlu0 %1148 }
 0xc44   :  { %v1153_v45 = vmul.f32 0.03125, %v1149_v44 }
 0xc46   :  { %v1155_v46 = vadd.f32 1e-12, %v1153_v45 }
 0xc47   :  { %v1152_v47 = vpop.xlane.xlu0 %1151 }
 0xc48   :  { %3730 = vrsqrt.f32 %v1155_v46  ;;  %v1154_v49 = vmul.f32 0.03125, %v1152_v47 }
 0xc4a   :  { %v1156_v41 = vadd.f32 1e-12, %v1154_v49 }
 0xc4c   :  { %3732 = vrsqrt.f32 %v1156_v41 }
 0xc52   :  { %v3731_v50 = vpop.eup %3730 }
 0xc53   :  { %v1159_v52 = vmul.f32 %v3731_v50, %v1143_v30 }
 0xc55   :  { %v1167_v56 = vmul.f32 %v2974_v51, %v1159_v52 }
 0xc56   :  { %v3733_v59 = vpop.eup %3732 }
 0xc57   :  { %v1160_v61 = vmul.f32 %v3733_v59, %v1144_v29  ;;  %v1175_v62 = vadd.f32 %v2975_v55, %v1167_v56  ;;  %v2985_v56 = vld [vmem:[%s4513_s26 + $0x28] sm:$0xff] }
 0xc59   :  { %v1168_v63 = vmul.f32 %v2974_v51, %v1160_v61  ;;  %3272 = vmatprep.mubr.msk.f32.mxu1 %vm70_vm0, %v1175_v62  ;;  %v2986_v61 = vld [vmem:[%s4513_s26 + $0x30] sm:$0xff] }
 0xc5b   :  { %v1176_v0 = vadd.f32 %v2975_v55, %v1168_v63  ;;  %v2984_v55 = vld [vmem:[%s4513_s26 + $0x20] sm:$0xff] }
 0xc5c   :  { %v3504_v59 = vpack.c.bf16 %v2985_v56, %v2984_v55 }
 0xc5d   :  { %3273 = vmatmul.mubr.msk.f32.vlgmr.msra.gmra.mrb[8].mxu1 %vm70_vm0, %v1176_v0 }
 0xc5e   :  { %3505 = vmatprep.subr.bf16.mxu1 %v3504_v59 }
 0xc5f   :  { %3507 = vmatpush3.bf16.msra.mxu1 %v3504_v59 }
 0xd30   :  { %v3274_v13 = vpop.f32.mrb[8].mxu1 }
 0xd31   :  { %v1266_v40 = vadd.f32 %v3274_v13, %v2976_v12  ;;  %v1260_v14 = vpop.f32.mrb[9].mxu1 }
 0xd32   :  { %v1261_v38 = vadd.f32 %v2976_v12, %v1260_v14  ;;  %v2989_v14 = vld [vmem:[%s4474_s5 + $0x1] ss:$0 sm:$0xff]  ;;  %s4519_s5 = smov 80  }
 0xd33   :  { %v1270_v15 = vmul.f32 %v1266_v40, %v1266_v40 }
 0xd34   :  { %v1269_v16 = vmul.f32 %v1261_v38, %v1261_v38 }
 0xd35   :  { %v1272_v17 = vmul.f32 %v1270_v15, %v1266_v40 }
 0xd36   :  { %v1271_v58 = vmul.f32 %v1269_v16, %v1261_v38 }
 0xd37   :  { %v1274_v18 = vmul.f32 0.044715, %v1272_v17 }
 0xd38   :  { %v1273_v19 = vmul.f32 0.044715, %v1271_v58 }
 0xd39   :  { %v1276_v57 = vadd.f32 %v1274_v18, %v1266_v40 }
 0xd3a   :  { %v1275_v20 = vadd.f32 %v1273_v19, %v1261_v38 }
 0xd3b   :  { %v1278_v21 = vmul.f32 0.7978846, %v1276_v57 }
 0xd3c   :  { %v1277_v22 = vmul.f32 0.7978846, %v1275_v20 }
 0xd3d   :  { %3734 = vtanh.f32 %v1278_v21 }
 0xd3e   :  { %3736 = vtanh.f32 %v1277_v22 }
 0xd47   :  { %v3735_v23 = vpop.eup %3734 }
 0xd48   :  { %v3737_v24 = vpop.eup %3736  ;;  %v1282_v25 = vadd.f32 1.0, %v3735_v23 }
 0xd49   :  { %v1281_v26 = vadd.f32 1.0, %v3737_v24 }
 0xd4a   :  { %v1284_v27 = vmul.f32 0.5, %v1282_v25 }
 0xd4b   :  { %v1283_v28 = vmul.f32 0.5, %v1281_v26 }
 0xd4c   :  { %v1286_v30 = vmul.f32 %v1284_v27, %v1266_v40 }
 0xd4d   :  { %v1285_v29 = vmul.f32 %v1283_v28, %v1261_v38 }
 0xd4f   :  { %3291 = vmatprep.mubr.msk.f32.mxu0 %vm1302_vm5, %v1285_v29 }
 0xd50   :  { %3292 = vmatmul.mubr.msk.f32.vlgmr.msra.gmra.mrb[12].mxu0 %vm1302_vm5, %v1286_v30 }
 0xe23   :  { %v3293_v32 = vpop.f32.mrb[12].mxu0 }
 0xe24   :  { %v1381_v34 = vadd.f32 %v3293_v32, %v2979_v31  ;;  %v1375_v35 = vpop.f32.mrb[13].mxu0 }
 0xe25   :  { %v1376_v33 = vadd.f32 %v2979_v31, %v1375_v35 }
 0xe26   :  { %v1385_v36 = vadd.f32 %v1381_v34, %v1176_v0 }
 0xe27   :  { %v1384_v37 = vadd.f32 %v1376_v33, %v1175_v62  ;;  %v2987_v62 = vld [vmem:[%s4513_s26 + $0x38] sm:$0xff] }
 0xe28   :  { %v1391_v39 = vsel %vm70_vm0, %v1385_v36, 0.0  ;;  %v3508_v63 = vpack.c.bf16 %v2987_v62, %v2986_v61 }
 0xe29   :  { %1392 = vadd.xlane.f32.xlu1 %v1391_v39  ;;  %v1388_v42 = vsel %vm70_vm0, %v1384_v37, 0.0 }
 0xe2a   :  { %1389 = vadd.xlane.f32.xlu0 %v1388_v42  ;;  %3509 = vmatprep.subr.bf16.mxu1 %v3508_v63 }
 0xe2b   :  { %3511 = vmatpush3.bf16.msra.mxu1 %v3508_v63 }
 0xeb6   :  { %v1393_v43 = vpop.xlane.xlu1 %1392 }
 0xeb7   :  { %v1395_v44 = vmul.f32 0.03125, %v1393_v43  ;;  %v1390_v45 = vpop.xlane.xlu0 %1389 }
 0xeb8   :  { %v1394_v46 = vmul.f32 0.03125, %v1390_v45 }
 0xeb9   :  { %v1397_v47 = vsub.f32 %v1385_v36, %v1395_v44 }
 0xeba   :  { %v1396_v49 = vsub.f32 %v1384_v37, %v1394_v46 }
 0xebb   :  { %v1399_v41 = vmul.f32 %v1397_v47, %v1397_v47 }
 0xebc   :  { %v1398_v50 = vmul.f32 %v1396_v49, %v1396_v49 }
 0xebd   :  { %v1403_v51 = vsel %vm70_vm0, %v1399_v41, 0.0 }
 0xebe   :  { %1404 = vadd.xlane.f32.xlu1 %v1403_v51  ;;  %v1400_v52 = vsel %vm70_vm0, %v1398_v50, 0.0 }
 0xebf   :  { %1401 = vadd.xlane.f32.xlu0 %v1400_v52 }
 0xf4b   :  { %v1405_v0 = vpop.xlane.xlu1 %1404 }
 0xf4c   :  { %v1407_v1 = vmul.f32 0.03125, %v1405_v0  ;;  %v1402_v60 = vpop.xlane.xlu0 %1401 }
 0xf4d   :  { %v1406_v2 = vmul.f32 0.03125, %v1402_v60 }
 0xf4e   :  { %v1409_v3 = vadd.f32 1e-12, %v1407_v1 }
 0xf4f   :  { %v1408_v4 = vadd.f32 1e-12, %v1406_v2 }
 0xf50   :  { %3738 = vrsqrt.f32 %v1409_v3 }
 0xf51   :  { %3740 = vrsqrt.f32 %v1408_v4 }
 0xf5a   :  { %v3739_v5 = vpop.eup %3738 }
 0xf5b   :  { %v3741_v7 = vpop.eup %3740  ;;  %v1413_v8 = vmul.f32 %v3739_v5, %v1397_v47 }
 0xf5c   :  { %v1412_v9 = vmul.f32 %v3741_v7, %v1396_v49 }
 0xf5d   :  { %v1421_v11 = vmul.f32 %v2982_v6, %v1413_v8 }
 0xf5e   :  { %v1420_v12 = vmul.f32 %v2982_v6, %v1412_v9 }
 0xf5f   :  { %v4209_v40 = vadd.f32 %v2983_v10, %v1421_v11 }
 0xf60   :  { %v4207_v13 = vadd.f32 %v2983_v10, %v1420_v12 }
 0xf62   :  { %3302 = vmatprep.mubr.msk.f32.mxu1 %vm70_vm0, %v4207_v13 }
 0xf63   :  { %3303 = vmatmul.mubr.msk.f32.vlgmr.msra.gmra.mrb[10].mxu1 %vm70_vm0, %v4209_v40 }
0x1036   :  { %v3304_v38 = vpop.f32.mrb[10].mxu1 }
0x1037   :  { %v4218_v15 = vadd.f32 %v3304_v38, %v2989_v14  ;;  %v1515_v16 = vpop.f32.mrb[11].mxu1 }
0x1038   :  { %v4220_v17 = vadd.f32 %v2989_v14, %v1515_v16 }
0x103a   :  { %3309 = vmatprep.mubr.msk.f32.mxu1 %vm214_vm1, %v4220_v17  ;;  %v4226_v58 = vpack.i.bf16 %v4218_v15, %v4220_v17 }
0x103c   :  { %3660 = vrot.lane.b32.xlu1 %v4226_v58, %s3814_s27  ;;  %3655 = vrot.lane.b32.xlu0 %v4226_v58, %s3815_s28  ;;  %s4520_s27 = smov 112  }
0x1040   :  { %1722 = vrot.lane.b32.xlu1 %v4220_v17, %s3816_s4 }
0x1044   :  { %1724 = vrot.lane.b32.xlu1 %v4218_v15, %s3816_s4 }
0x10ae   :  { %v3661_v18 = vpop.permute.xlu1 %3660  ;;  %v3656_v19 = vpop.permute.xlu0 %3655 }
0x10af   :  { %v3663_v57 = vunpack.i.h.bf16 %v3661_v18  ;;  %v3662_v20 = vunpack.i.l.bf16 %v3661_v18  ;;  %v3658_v21 = vunpack.i.h.bf16 %v3656_v19  ;;  %v3657_v22 = vunpack.i.l.bf16 %v3656_v19 }
0x10b1   :  { %v3512_v23 = vpack.c.bf16 %v3658_v21, %v3657_v22  ;;  %v3522_v24 = vpack.c.bf16 %v3663_v57, %v3662_v20 }
0x10b2   :  { %v1723_v25 = vpop.permute.xlu1 %1722 }
0x10b3   :  { %3514 = vmatprep.subr.msk.bf16.mxu1 %vm3996_vm2, %v3512_v23 }
0x10b4   :  { %3517 = vmatpush3.bf16.xpose.msk.msra.mxu1 %vm3996_vm2, %v3512_v23 }
0x10b5   :  { %3524 = vmatprep.subr.msk.bf16.mxu1 %vm3996_vm2, %v3522_v24 }
0x10b6   :  { %v1725_v26 = vpop.permute.xlu1 %1724 }
0x10bb   :  { %3310 = vmatmul.mubr.msk.f32.vlgmr.msra.gmra.mrb[12].mxu1 %vm214_vm1, %v4218_v15 }
0x10bc   :  { %3527 = vmatpush3.bf16.xpose.msk.msra.mxu1 %vm3996_vm2, %v3522_v24  ;;  %3323 = vmatprep.mubr.msk.f32.mxu1 %vm214_vm1, %v1723_v25 }
0x10c3   :  { %3324 = vmatmul.mubr.msk.f32.vlgmr.msra.gmra.mrb[14].mxu1 %vm214_vm1, %v1725_v26 }
0x118e   :  { %v3311_v27 = vpop.f32.mrb[12].mxu1 }
0x118f   :  { %v1610_v28 = vadd.f32 %v3311_v27, %v4015_v53  ;;  %v1604_v29 = vpop.f32.mrb[13].mxu1 }
0x1190   :  { %v1605_v30 = vadd.f32 %v1604_v29, %v4020_v54 }
0x1191   :  { %v1616_v31 = vsel %vm298_vm3, %v1610_v28, -inf }
0x1192   :  { %1617 = vmax.xlane.f32.xlu1 %v1616_v31  ;;  %v1613_v32 = vsel %vm298_vm3, %v1605_v30, -inf }
0x1193   :  { %1614 = vmax.xlane.f32.xlu0 %v1613_v32  ;;  %v3788_v32 = vld [vmem:[%s4518_s0 + $0x8] sm:$0xff] }
0x1196   :  { %v3325_v34 = vpop.f32.mrb[14].mxu1 }
0x1197   :  { %v1804_v35 = vpop.f32.mrb[15].mxu1  ;;  %v1810_v36 = vadd.f32 %v3325_v34, %v4015_v53 }
0x1198   :  { %v1805_v33 = vadd.f32 %v1804_v35, %v4020_v54 }
0x1199   :  { %v1816_v39 = vsel %vm298_vm3, %v1810_v36, -inf }
0x119a   :  { %v1813_v37 = vsel %vm298_vm3, %v1805_v33, -inf }
0x119b   :  { %1814 = vmax.xlane.f32.xlu0 %v1813_v37 }
0x119f   :  { %1817 = vmax.xlane.f32.xlu0 %v1816_v39 }
0x121f   :  { %v1618_v42 = vpop.xlane.xlu1 %1617 }
0x1220   :  { %v1620_v43 = vsub.f32 %v1610_v28, %v1618_v42  ;;  %v1615_v44 = vpop.xlane.xlu0 %1614 }
0x1221   :  { %v1619_v45 = vsub.f32 %v1605_v30, %v1615_v44 }
0x1222   :  { %v1623_v46 = vmul.f32 1.442695, %v1620_v43 }
0x1223   :  { %v1621_v47 = vmul.f32 1.442695, %v1619_v45 }
0x1224   :  { %3742 = vpow2.f32 %v1623_v46 }
0x1225   :  { %3744 = vpow2.f32 %v1621_v47 }
0x1228   :  { %v1815_v49 = vpop.xlane.xlu0 %1814 }
0x1229   :  { %v1819_v41 = vsub.f32 %v1805_v33, %v1815_v49  ;;  %v3789_v33 = vld [vmem:[%s4518_s0] sm:$0xff]  ;;  %s4523_s0 = smov 72  }
0x122b   :  { %v1821_v50 = vmul.f32 1.442695, %v1819_v41 }
0x122c   :  { %v1818_v54 = vpop.xlane.xlu0 %1817 }
0x122d   :  { %3746 = vpow2.f32 %v1821_v50  ;;  %v1820_v53 = vsub.f32 %v1810_v36, %v1818_v54 }
0x122e   :  { %v3743_v51 = vpop.eup %3742 }
0x122f   :  { %v3745_v52 = vpop.eup %3744  ;;  %v1823_v55 = vmul.f32 1.442695, %v1820_v53  ;;  %v1628_v56 = vsel %vm298_vm3, %v3743_v51, 0.0 }
0x1230   :  { %1629 = vadd.xlane.f32.xlu1 %v1628_v56  ;;  %v1625_v59 = vsel %vm298_vm3, %v3745_v52, 0.0 }
0x1231   :  { %3748 = vpow2.f32 %v1823_v55  ;;  %1626 = vadd.xlane.f32.xlu0 %v1625_v59 }
0x1237   :  { %v3747_v61 = vpop.eup %3746 }
0x1238   :  { %v1825_v62 = vsel %vm298_vm3, %v3747_v61, 0.0 }
0x1239   :  { %1826 = vadd.xlane.f32.xlu0 %v1825_v62 }
0x123b   :  { %v3749_v63 = vpop.eup %3748 }
0x123c   :  { %v1828_v0 = vsel %vm298_vm3, %v3749_v63, 0.0 }
0x123d   :  { %1829 = vadd.xlane.f32.xlu1 %v1828_v0 }
0x124e   :  { %3670 = vrot.lane.b32.xlu1 %v4226_v58, %s3817_s22  ;;  %s4527_s22 = smov 24  }
0x124f   :  { %3665 = vrot.lane.b32.xlu0 %v4226_v58, %s3818_s23 }
0x1252   :  { %3675 = vrot.lane.b32.xlu1 %v4226_v58, %s4519_s5 }
0x1253   :  { %1924 = vrot.lane.b32.xlu0 %v4218_v15, %s4520_s27 }
0x1256   :  { %1922 = vrot.lane.b32.xlu1 %v4220_v17, %s4520_s27 }
0x12bd   :  { %v1630_v60 = vpop.xlane.xlu1 %1629 }
0x12be   :  { %v1627_v1 = vpop.xlane.xlu0 %1626 }
0x12bf   :  { %3750 = vrcp.f32 %v1627_v1 }
0x12c0   :  { %3752 = vrcp.f32 %v1630_v60 }
0x12c6   :  { %v1827_v2 = vpop.xlane.xlu0 %1826 }
0x12c7   :  { %3754 = vrcp.f32 %v1827_v2 }
0x12c9   :  { %v3751_v3 = vpop.eup %3750 }
0x12ca   :  { %v1830_v4 = vpop.xlane.xlu1 %1829  ;;  %v3666_v5 = vpop.permute.xlu0 %3665  ;;  %v1633_v6 = vmul.f32 %v3751_v3, %v3745_v52 }
0x12cb   :  { %3756 = vrcp.f32 %v1830_v4  ;;  %v3668_v7 = vunpack.i.h.bf16 %v3666_v5  ;;  %v3667_v8 = vunpack.i.l.bf16 %v3666_v5  ;;  %v3753_v10 = vpop.eup %3752 }
0x12cc   :  { %3316 = vmatprep.mubr.msk.f32.mxu0 %vm298_vm3, %v1633_v6  ;;  %v1634_v16 = vmul.f32 %v3753_v10, %v3743_v51 }
0x12cd   :  { %v3518_v9 = vpack.c.bf16 %v3668_v7, %v3667_v8 }
0x12ce   :  { %v3671_v11 = vpop.permute.xlu1 %3670  ;;  %v1925_v26 = vpop.permute.xlu0 %1924 }
0x12cf   :  { %v3673_v12 = vunpack.i.h.bf16 %v3671_v11  ;;  %v3672_v14 = vunpack.i.l.bf16 %v3671_v11  ;;  %3519 = vmatprep.subr.bf16.mxu0 %v3518_v9 }
0x12d0   :  { %3521 = vmatpush3.bf16.msra.mxu0 %v3518_v9 }
0x12d1   :  { %v3755_v38 = vpop.eup %3754  ;;  %v3528_v18 = vpack.c.bf16 %v3673_v12, %v3672_v14 }
0x12d2   :  { %v3676_v19 = vpop.permute.xlu1 %3675  ;;  %v1833_v57 = vmul.f32 %v3755_v38, %v3747_v61 }
0x12d3   :  { %v3678_v20 = vunpack.i.h.bf16 %v3676_v19  ;;  %v3677_v21 = vunpack.i.l.bf16 %v3676_v19  ;;  %3317 = vmatmul.mubr.msk.f32.vlgmr.msra.gmra.mrb[14].mxu0 %vm298_vm3, %v1634_v16  ;;  %3529 = vmatprep.subr.bf16.mxu0 %v3528_v18 }
0x12d4   :  { %3531 = vmatpush3.bf16.msra.mxu0 %v3528_v18  ;;  %3330 = vmatprep.mubr.msk.f32.mxu0 %vm298_vm3, %v1833_v57 }
0x12d5   :  { %v3757_v22 = vpop.eup %3756  ;;  %v3532_v23 = vpack.c.bf16 %v3678_v20, %v3677_v21 }
0x12d6   :  { %v1834_v24 = vmul.f32 %v3757_v22, %v3749_v63  ;;  %v1923_v25 = vpop.permute.xlu1 %1922 }
0x12d7   :  { %3534 = vmatprep.subr.msk.bf16.mxu0 %vm3996_vm2, %v3532_v23 }
0x12d8   :  { %3331 = vmatmul.mubr.msk.f32.vlgmr.msra.gmra.mrb[16].mxu0 %vm298_vm3, %v1834_v24 }
0x12d9   :  { %3337 = vmatprep.mubr.msk.f32.mxu0 %vm214_vm1, %v1923_v25 }
0x12dd   :  { %3537 = vmatpush3.bf16.xpose.msk.msra.mxu0 %vm3996_vm2, %v3532_v23 }
0x12e4   :  { %3338 = vmatmul.mubr.msk.f32.vlgmr.msra.gmra.mrb[18].mxu0 %vm214_vm1, %v1925_v26 }
0x13a6   :  { %v4280_v27 = vpop.f32.mrb[14].mxu0 }
0x13a7   :  { %v4282_v28 = vpop.f32.mrb[15].mxu0 }
0x13ab   :  { %v4284_v29 = vpop.f32.mrb[16].mxu0 }
0x13ac   :  { %v4286_v30 = vpop.f32.mrb[17].mxu0 }
0x13b7   :  { %v3339_v31 = vpop.f32.mrb[18].mxu0 }
0x13b8   :  { %v2010_v34 = vadd.f32 %v3788_v32, %v3339_v31  ;;  %v2004_v35 = vpop.f32.mrb[19].mxu0 }
0x13b9   :  { %v2005_v36 = vadd.f32 %v3789_v33, %v2004_v35  ;;  %v3016_v35 = vld [vmem:[%s4475_s6 + $0x20] sm:$0xff] }
0x13ba   :  { %v2016_v37 = vsel %vm298_vm3, %v2010_v34, -inf }
0x13bb   :  { %2017 = vmax.xlane.f32.xlu0 %v2016_v37  ;;  %v2013_v39 = vsel %vm298_vm3, %v2005_v36, -inf  ;;  %v3019_v37 = vld [vmem:[%s4475_s6 + $0x38] sm:$0xff] }
0x13bc   :  { %2014 = vmax.xlane.f32.xlu1 %v2013_v39 }
0x13cd   :  { %3680 = vrot.lane.b32.xlu1 %v4226_v58, %s4521_s1 }
0x13d1   :  { %2122 = vrot.lane.b32.xlu1 %v4220_v17, %s4522_s24 }
0x13d5   :  { %2124 = vrot.lane.b32.xlu1 %v4218_v15, %s4522_s24 }
0x1448   :  { %v2018_v42 = vpop.xlane.xlu0 %2017 }
0x1449   :  { %v2020_v43 = vsub.f32 %v2010_v34, %v2018_v42  ;;  %v2015_v44 = vpop.xlane.xlu1 %2014 }
0x144a   :  { %v2019_v45 = vsub.f32 %v2005_v36, %v2015_v44 }
0x144b   :  { %v2023_v46 = vmul.f32 1.442695, %v2020_v43 }
0x144c   :  { %v2021_v47 = vmul.f32 1.442695, %v2019_v45 }
0x144d   :  { %3758 = vpow2.f32 %v2023_v46  ;;  %v3681_v49 = vpop.permute.xlu1 %3680 }
0x144e   :  { %v3683_v41 = vunpack.i.h.bf16 %v3681_v49  ;;  %v3682_v50 = vunpack.i.l.bf16 %v3681_v49  ;;  %3760 = vpow2.f32 %v2021_v47 }
0x1450   :  { %v3538_v54 = vpack.c.bf16 %v3683_v41, %v3682_v50 }
0x1451   :  { %v2123_v2 = vpop.permute.xlu1 %2122 }
0x1452   :  { %3539 = vmatprep.subr.bf16.mxu1 %v3538_v54 }
0x1453   :  { %3541 = vmatpush3.bf16.msra.mxu1 %v3538_v54 }
0x1455   :  { %v2125_v3 = vpop.permute.xlu1 %2124 }
0x1457   :  { %v3759_v53 = vpop.eup %3758 }
0x1458   :  { %v2028_v17 = vsel %vm298_vm3, %v3759_v53, 0.0  ;;  %v3761_v51 = vpop.eup %3760 }
0x1459   :  { %2029 = vadd.xlane.f32.xlu0 %v2028_v17  ;;  %v2025_v15 = vsel %vm298_vm3, %v3761_v51, 0.0 }
0x145d   :  { %2026 = vadd.xlane.f32.xlu0 %v2025_v15 }
0x1473   :  { %3685 = vrot.lane.b32.xlu0 %v4226_v58, %s4523_s0 }
0x14e6   :  { %v2030_v52 = vpop.xlane.xlu0 %2029 }
0x14e7   :  { %3762 = vrcp.f32 %v2030_v52 }
0x14ea   :  { %v2027_v55 = vpop.xlane.xlu0 %2026 }
0x14eb   :  { %3764 = vrcp.f32 %v2027_v55 }
0x14ee   :  { %v3686_v56 = vpop.permute.xlu0 %3685 }
0x14ef   :  { %v3688_v59 = vunpack.i.h.bf16 %v3686_v56  ;;  %v3687_v61 = vunpack.i.l.bf16 %v3686_v56 }
0x14f1   :  { %v3542_v62 = vpack.c.bf16 %v3688_v59, %v3687_v61  ;;  %v3763_v63 = vpop.eup %3762 }
0x14f2   :  { %v2034_v60 = vmul.f32 %v3763_v63, %v3759_v53 }
0x14f3   :  { %3544 = vmatprep.subr.msk.bf16.mxu1 %vm3996_vm2, %v3542_v62 }
0x14f5   :  { %v3765_v0 = vpop.eup %3764 }
0x14f6   :  { %v2033_v1 = vmul.f32 %v3765_v0, %v3761_v51 }
0x14f8   :  { %3344 = vmatprep.mubr.msk.f32.mxu1 %vm298_vm3, %v2033_v1 }
0x14f9   :  { %3345 = vmatmul.mubr.msk.f32.vlgmr.msra.gmra.mrb[16].mxu1 %vm298_vm3, %v2034_v60 }
0x14fa   :  { %3547 = vmatpush3.bf16.xpose.msk.msra.mxu1 %vm3996_vm2, %v3542_v62  ;;  %3351 = vmatprep.mubr.msk.f32.mxu1 %vm214_vm1, %v2123_v2 }
0x1501   :  { %3352 = vmatmul.mubr.msk.f32.vlgmr.msra.gmra.mrb[18].mxu1 %vm214_vm1, %v2125_v3 }
0x15cc   :  { %v3346_v4 = vpop.f32.mrb[16].mxu1 }
0x15cd   :  { %v2113_v5 = vpop.f32.mrb[17].mxu1 }
0x15d4   :  { %v3353_v6 = vpop.f32.mrb[18].mxu1 }
0x15d5   :  { %v2210_v7 = vadd.f32 %v3788_v32, %v3353_v6  ;;  %v2204_v8 = vpop.f32.mrb[19].mxu1 }
0x15d6   :  { %v2205_v9 = vadd.f32 %v3789_v33, %v2204_v8  ;;  %v3018_v33 = vld [vmem:[%s4475_s6 + $0x30] sm:$0xff]  ;;  %v3029_v8 = vld [vmem:[%s4479_s10 + $0x28] sm:$0xff] }
0x15d7   :  { %v2216_v10 = vsel %vm298_vm3, %v2210_v7, -inf  ;;  %v3556_v39 = vpack.c.bf16 %v3019_v37, %v3018_v33  ;;  %v3041_v37 = vld [vmem:[%s4481_s12 + $0x68] sm:$0xff] }
0x15d8   :  { %2217 = vmax.xlane.f32.xlu0 %v2216_v10  ;;  %v2213_v11 = vsel %vm298_vm3, %v2205_v9, -inf  ;;  %v3030_v10 = vld [vmem:[%s4479_s10 + $0x30] sm:$0xff] }
0x15d9   :  { %2214 = vmax.xlane.f32.xlu1 %v2213_v11  ;;  %v3031_v11 = vld [vmem:[%s4479_s10 + $0x38] sm:$0xff] }
0x15ea   :  { %3690 = vrot.lane.b32.xlu1 %v4226_v58, %s4524_s2 }
0x15ee   :  { %2326 = vrot.lane.b32.xlu1 %v4284_v29, %s4525_s25 }
0x15f2   :  { %2332 = vrot.lane.b32.xlu1 %v2113_v5, %s4526_s3 }
0x15f6   :  { %2334 = vrot.lane.b32.xlu1 %v3346_v4, %s4526_s3 }
0x1665   :  { %v2218_v48 = vpop.xlane.xlu0 %2217 }
0x1666   :  { %v2220_v12 = vsub.f32 %v2210_v7, %v2218_v48  ;;  %v2215_v14 = vpop.xlane.xlu1 %2214  ;;  %v3564_v48 = vpack.c.bf16 %v3031_v11, %v3030_v10 }
0x1667   :  { %v2219_v38 = vsub.f32 %v2205_v9, %v2215_v14 }
0x1668   :  { %v2223_v16 = vmul.f32 1.442695, %v2220_v12 }
0x1669   :  { %v2221_v18 = vmul.f32 1.442695, %v2219_v38 }
0x166a   :  { %v3691_v19 = vpop.permute.xlu1 %3690 }
0x166b   :  { %3766 = vpow2.f32 %v2221_v18  ;;  %v3693_v57 = vunpack.i.h.bf16 %v3691_v19  ;;  %v3692_v20 = vunpack.i.l.bf16 %v3691_v19 }
0x166c   :  { %3768 = vpow2.f32 %v2223_v16 }
0x166d   :  { %v3548_v21 = vpack.c.bf16 %v3693_v57, %v3692_v20  ;;  %v3026_v20 = vld [vmem:[%s4477_s8 + $0x1] ss:$0 sm:$0xff] }
0x166e   :  { %v2327_v44 = vpop.permute.xlu1 %2326 }
0x166f   :  { %3549 = vmatprep.subr.bf16.mxu0 %v3548_v21  ;;  %v2347_v50 = vsel %vm214_vm1, %v4280_v27, %v2327_v44 }
0x1670   :  { %3551 = vmatpush3.bf16.msra.mxu0 %v3548_v21 }
0x1672   :  { %v2333_v45 = vpop.permute.xlu1 %2332 }
0x1675   :  { %v3767_v58 = vpop.eup %3766 }
0x1676   :  { %v2225_v22 = vsel %vm298_vm3, %v3767_v58, 0.0  ;;  %v3769_v23 = vpop.eup %3768  ;;  %v2335_v47 = vpop.permute.xlu1 %2334 }
0x1677   :  { %2226 = vadd.xlane.f32.xlu0 %v2225_v22  ;;  %v2228_v24 = vsel %vm298_vm3, %v3769_v23, 0.0  ;;  %v2349_v17 = vsel %vm298_vm3, %v2347_v50, %v2335_v47 }
0x167b   :  { %2229 = vadd.xlane.f32.xlu0 %v2228_v24 }
0x1691   :  { %2324 = vrot.lane.b32.xlu0 %v4286_v30, %s4525_s25  ;;  %v3017_v30 = vld [vmem:[%s4475_s6 + $0x28] sm:$0xff] }
0x1692   :  { %v3552_v36 = vpack.c.bf16 %v3017_v30, %v3016_v35  ;;  %v3038_v35 = vld [vmem:[%s4481_s12 + $0x50] sm:$0xff]  ;;  %v3039_v30 = vld [vmem:[%s4481_s12 + $0x58] sm:$0xff] }
0x1693   :  { %v3572_v33 = vpack.c.bf16 %v3039_v30, %v3038_v35 }
0x1694   :  { %3553 = vmatprep.subr.bf16.mxu0 %v3552_v36 }
0x1704   :  { %v2227_v25 = vpop.xlane.xlu0 %2226 }
0x1705   :  { %3770 = vrcp.f32 %v2227_v25 }
0x1708   :  { %v2230_v26 = vpop.xlane.xlu0 %2229 }
0x1709   :  { %3772 = vrcp.f32 %v2230_v26 }
0x170c   :  { %v2325_v46 = vpop.permute.xlu0 %2324 }
0x170d   :  { %v2346_v49 = vsel %vm214_vm1, %v4282_v28, %v2325_v46  ;;  %v3021_v28 = vld [vmem:[%s4476_s7 + $0x1] ss:$0 sm:$0xff] }
0x170e   :  { %v2348_v54 = vsel %vm298_vm3, %v2346_v49, %v2333_v45  ;;  %v3033_v45 = vld [vmem:[%s4480_s11 + $0x1] ss:$0 sm:$0xff] }
0x170f   :  { %v3771_v29 = vpop.eup %3770 }
0x1710   :  { %v2233_v31 = vmul.f32 %v3771_v29, %v3767_v58  ;;  %v3027_v58 = vld [vmem:[%s4478_s9 + $0x1] ss:$0 sm:$0xff] }
0x1712   :  { %3358 = vmatprep.mubr.msk.f32.mxu0 %vm298_vm3, %v2233_v31  ;;  %v3036_v31 = vld [vmem:[%s4481_s12 + $0x40] sm:$0xff] }
0x1713   :  { %v3773_v32 = vpop.eup %3772 }
0x1714   :  { %v2234_v34 = vmul.f32 %v3773_v32, %v3769_v23  ;;  %v3037_v32 = vld [vmem:[%s4481_s12 + $0x48] sm:$0xff] }
0x1716   :  { %3359 = vmatmul.mubr.msk.f32.vlgmr.msra.gmra.mrb[20].mxu0 %vm298_vm3, %v2234_v34  ;;  %v3568_v34 = vpack.c.bf16 %v3037_v32, %v3036_v31 }
0x1717   :  { %3555 = vmatpush3.bf16.msra.mxu0 %v3552_v36  ;;  %v3040_v36 = vld [vmem:[%s4481_s12 + $0x60] sm:$0xff] }
0x1718   :  { %3557 = vmatprep.subr.bf16.mxu0 %v3556_v39 }
0x171b   :  { %3559 = vmatpush3.bf16.msra.mxu0 %v3556_v39  ;;  %v3576_v39 = vpack.c.bf16 %v3041_v37, %v3040_v36 }
0x171c   :  { %3569 = vmatprep.subr.bf16.mxu0 %v3568_v34 }
0x17e9   :  { %v3360_v42 = vpop.f32.mrb[20].mxu0 }
0x17ea   :  { %2342 = vrot.lane.b32.xlu1 %v3360_v42, %s4527_s22  ;;  %v2313_v43 = vpop.f32.mrb[21].mxu0  ;;  %v3042_v42 = vld [vmem:[%s4481_s12 + $0x70] sm:$0xff] }
0x17eb   :  { %2340 = vrot.lane.b32.xlu0 %v2313_v43, %s4527_s22  ;;  %v3043_v43 = vld [vmem:[%s4481_s12 + $0x78] sm:$0xff] }
0x17ec   :  { %v3580_v44 = vpack.c.bf16 %v3043_v43, %v3042_v42  ;;  %v3051_v42 = vld [vmem:[%s4484_s15 + $0x1] ss:$0 sm:$0xff] }
0x185c   :  { %v2343_v41 = vpop.permute.xlu1 %2342 }
0x185d   :  { %v2341_v53 = vpop.permute.xlu0 %2340  ;;  %v2351_v15 = vsel %vm1036_vm4, %v2349_v17, %v2343_v41 }
0x185e   :  { %v2350_v51 = vsel %vm1036_vm4, %v2348_v54, %v2341_v53 }
0x185f   :  { %3369 = vmatprep.mubr.msk.f32.mxu0 %vm70_vm0, %v2350_v51 }
0x1860   :  { %3370 = vmatmul.mubr.msk.f32.vlgmr.msra.gmra.mrb[22].mxu0 %vm70_vm0, %v2351_v15 }
0x1861   :  { %3571 = vmatpush3.bf16.msra.mxu0 %v3568_v34 }
0x1862   :  { %3573 = vmatprep.subr.bf16.mxu0 %v3572_v33 }
0x1865   :  { %3575 = vmatpush3.bf16.msra.mxu0 %v3572_v33  ;;  %v3050_v33 = vld [vmem:[%s4483_s14 + $0x1] ss:$0 sm:$0xff] }
0x1866   :  { %3577 = vmatprep.subr.bf16.mxu0 %v3576_v39 }
0x1869   :  { %3579 = vmatpush3.bf16.msra.mxu0 %v3576_v39 }
0x186a   :  { %3581 = vmatprep.subr.bf16.mxu0 %v3580_v44 }
0x186d   :  { %3583 = vmatpush3.bf16.msra.mxu0 %v3580_v44 }
0x1933   :  { %v3371_v52 = vpop.f32.mrb[22].mxu0 }
0x1934   :  { %v2443_v55 = vadd.f32 %v3371_v52, %v3021_v28  ;;  %v2437_v27 = vpop.f32.mrb[23].mxu0 }
0x1935   :  { %v2438_v56 = vadd.f32 %v3021_v28, %v2437_v27 }
0x1936   :  { %v2447_v59 = vadd.f32 %v2443_v55, %v4209_v40 }
0x1937   :  { %v2446_v61 = vadd.f32 %v2438_v56, %v4207_v13  ;;  %v3028_v13 = vld [vmem:[%s4479_s10 + $0x20] sm:$0xff] }
0x1938   :  { %v2455_v62 = vsel %vm70_vm0, %v2447_v59, 0.0  ;;  %v3560_v9 = vpack.c.bf16 %v3029_v8, %v3028_v13 }
0x1939   :  { %2456 = vadd.xlane.f32.xlu1 %v2455_v62  ;;  %v2452_v63 = vsel %vm70_vm0, %v2446_v61, 0.0 }
0x193a   :  { %2453 = vadd.xlane.f32.xlu0 %v2452_v63  ;;  %3561 = vmatprep.subr.bf16.mxu1 %v3560_v9 }
0x193b   :  { %3563 = vmatpush3.bf16.msra.mxu1 %v3560_v9 }
0x193c   :  { %3565 = vmatprep.subr.bf16.mxu1 %v3564_v48 }
0x193f   :  { %3567 = vmatpush3.bf16.msra.mxu1 %v3564_v48 }
0x19c6   :  { %v2457_v0 = vpop.xlane.xlu1 %2456 }
0x19c7   :  { %v2459_v1 = vmul.f32 0.03125, %v2457_v0  ;;  %v2454_v60 = vpop.xlane.xlu0 %2453 }
0x19c8   :  { %v2458_v2 = vmul.f32 0.03125, %v2454_v60 }
0x19c9   :  { %v2461_v3 = vsub.f32 %v2447_v59, %v2459_v1 }
0x19ca   :  { %v2460_v4 = vsub.f32 %v2446_v61, %v2458_v2  ;;  %v3045_v2 = vld [vmem:[%s4482_s13 + $0x1] ss:$0 sm:$0xff] }
0x19cb   :  { %v2463_v7 = vmul.f32 %v2461_v3, %v2461_v3 }
0x19cc   :  { %v2462_v5 = vmul.f32 %v2460_v4, %v2460_v4 }
0x19cd   :  { %v2467_v40 = vsel %vm70_vm0, %v2463_v7, 0.0 }
0x19ce   :  { %v2464_v6 = vsel %vm70_vm0, %v2462_v5, 0.0 }
0x19cf   :  { %2465 = vadd.xlane.f32.xlu0 %v2464_v6 }
0x19d3   :  { %2468 = vadd.xlane.f32.xlu0 %v2467_v40 }
0x1a5c   :  { %v2466_v12 = vpop.xlane.xlu0 %2465 }
0x1a5d   :  { %v2470_v14 = vmul.f32 0.03125, %v2466_v12 }
0x1a5f   :  { %v2472_v38 = vadd.f32 1e-12, %v2470_v14 }
0x1a60   :  { %v2469_v16 = vpop.xlane.xlu0 %2468 }
0x1a61   :  { %3774 = vrsqrt.f32 %v2472_v38  ;;  %v2471_v18 = vmul.f32 0.03125, %v2469_v16 }
0x1a63   :  { %v2473_v19 = vadd.f32 1e-12, %v2471_v18 }
0x1a65   :  { %3776 = vrsqrt.f32 %v2473_v19 }
0x1a6b   :  { %v3775_v57 = vpop.eup %3774 }
0x1a6c   :  { %v2476_v21 = vmul.f32 %v3775_v57, %v2460_v4  ;;  %v2757_v57 = vld [vmem:[%s4485_s16] sm:$0xff] }
0x1a6e   :  { %v2484_v22 = vmul.f32 %v3026_v20, %v2476_v21 }
0x1a6f   :  { %v3777_v23 = vpop.eup %3776 }
0x1a70   :  { %v2477_v24 = vmul.f32 %v3777_v23, %v2461_v3  ;;  %v2492_v25 = vadd.f32 %v3027_v58, %v2484_v22  ;;  %v2759_v22 = vld [vmem:[%s4485_s16 + $0x10] sm:$0xff]  ;;  %v2760_v23 = vld [vmem:[%s4485_s16 + $0x18] sm:$0xff] }
0x1a72   :  { %v2485_v26 = vmul.f32 %v3026_v20, %v2477_v24  ;;  %3380 = vmatprep.mubr.msk.f32.mxu1 %vm70_vm0, %v2492_v25  ;;  %v2758_v20 = vld [vmem:[%s4485_s16 + $0x8] sm:$0xff]  ;;  %v3588_v24 = vpack.c.bf16 %v2760_v23, %v2759_v22 }
0x1a73   :  { %v3585_v21 = vpack.c.bf16 %v2758_v20, %v2757_v57 }
0x1a74   :  { %v2493_v29 = vadd.f32 %v3027_v58, %v2485_v26  ;;  %v3828_v58 = vmov 0.0|0.0  }
0x1a75   :  { %3584 = vmatprep.subr.bf16.mxu1 %v3828_v58 }
0x1a76   :  { %3381 = vmatmul.mubr.msk.f32.vlgmr.msra.gmra.mrb[20].mxu1 %vm70_vm0, %v2493_v29 }
0x1a77   :  { %3586 = vmatpush3.bf16.msra.mxu1 %v3585_v21 }
0x1a78   :  { %3587 = vmatprep.subr.bf16.mxu1 %v3828_v58 }
0x1a7b   :  { %3589 = vmatpush3.bf16.msra.mxu1 %v3588_v24 }
0x1a7c   :  { %3590 = vmatprep.subr.bf16.mxu1 %v3828_v58 }
0x1b49   :  { %v3382_v46 = vpop.f32.mrb[20].mxu1 }
0x1b4a   :  { %v2585_v47 = vadd.f32 %v3382_v46, %v3033_v45  ;;  %v2579_v49 = vpop.f32.mrb[21].mxu1 }
0x1b4b   :  { %v2580_v41 = vadd.f32 %v3033_v45, %v2579_v49 }
0x1b4c   :  { %v2589_v50 = vmul.f32 %v2585_v47, %v2585_v47 }
0x1b4d   :  { %v2588_v54 = vmul.f32 %v2580_v41, %v2580_v41 }
0x1b4e   :  { %v2591_v53 = vmul.f32 %v2589_v50, %v2585_v47  ;;  %v2843_v50 = vld [vmem:[%s4487_s18 + $0x8] sm:$0xff] }
0x1b4f   :  { %v2590_v17 = vmul.f32 %v2588_v54, %v2580_v41  ;;  %v2844_v54 = vld [vmem:[%s4487_s18 + $0x10] sm:$0xff] }
0x1b50   :  { %v2593_v51 = vmul.f32 0.044715, %v2591_v53 }
0x1b51   :  { %v2592_v15 = vmul.f32 0.044715, %v2590_v17  ;;  %v2845_v17 = vld [vmem:[%s4487_s18 + $0x18] sm:$0xff] }
0x1b52   :  { %v2595_v28 = vadd.f32 %v2593_v51, %v2585_v47  ;;  %v3594_v51 = vpack.c.bf16 %v2845_v17, %v2844_v54 }
0x1b53   :  { %v2594_v52 = vadd.f32 %v2592_v15, %v2580_v41  ;;  %v3052_v15 = vld [vmem:[%s4486_s17] ss:$0 sm:$0xff] }
0x1b54   :  { %v2597_v55 = vmul.f32 0.7978846, %v2595_v28 }
0x1b55   :  { %v2596_v27 = vmul.f32 0.7978846, %v2594_v52 }
0x1b56   :  { %3778 = vtanh.f32 %v2597_v55 }
0x1b57   :  { %3780 = vtanh.f32 %v2596_v27 }
0x1b60   :  { %v3779_v56 = vpop.eup %3778 }
0x1b61   :  { %v3781_v59 = vpop.eup %3780  ;;  %v2601_v61 = vadd.f32 1.0, %v3779_v56  ;;  %v3054_v56 = vld [vmem:[%s4488_s19] ss:$0 sm:$0xff] }
0x1b62   :  { %v2600_v62 = vadd.f32 1.0, %v3781_v59 }
0x1b63   :  { %v2603_v63 = vmul.f32 0.5, %v2601_v61 }
0x1b64   :  { %v2602_v0 = vmul.f32 0.5, %v2600_v62 }
0x1b65   :  { %v2605_v60 = vmul.f32 %v2603_v63, %v2585_v47 }
0x1b66   :  { %v2604_v1 = vmul.f32 %v2602_v0, %v2580_v41  ;;  %v2842_v41 = vld [vmem:[%s4487_s18] sm:$0xff]  ;;  %s3831_s18 = smov [#allocation2]  }
0x1b67   :  { %v3591_v53 = vpack.c.bf16 %v2843_v50, %v2842_v41  ;;  %s2934_s29 = sshll.u32 %s3831_s18, 4  ;;  %s2935_s29 = int_to_ptr.vmem [resolvable:$true] %s2934_s29 }
0x1b68   :  { %3399 = vmatprep.mubr.msk.f32.mxu0 %vm1302_vm5, %v2604_v1  ;;  %s3790_s17 = scalar_lea.vmem %s2935_s29, 32  ;;  %p3795_p1 = scmp.lt.s32.totalorder %s2935_s29, %s2935_s29 }
0x1b69   :  { %3400 = vmatmul.mubr.msk.f32.vlgmr.msra.gmra.mrb[24].mxu0 %vm1302_vm5, %v2605_v60  ;;  %p3791_p0 = scmp.ne.s32.totalorder %s2935_s29, %s3790_s17  ;;  %p3796_p2 = scmp.lt.s32.totalorder %s3790_s17, %s3790_s17 }
0x1b6b   :  { %p3797_p3 = por %p3796_p2, %p3795_p1 }
0x1b6d   :  { %p3798_p4 = pnand %p3797_p3, %p3791_p0 }
0x1c3c   :  { %v3401_v3 = vpop.f32.mrb[24].mxu0 }
0x1c3d   :  { %v2701_v4 = vadd.f32 %v3401_v3, %v3045_v2  ;;  %v2695_v5 = vpop.f32.mrb[25].mxu0 }
0x1c3e   :  { %v2696_v6 = vadd.f32 %v3045_v2, %v2695_v5 }
0x1c3f   :  { %v2705_v7 = vadd.f32 %v2701_v4, %v2493_v29 }
0x1c40   :  { %v2704_v40 = vadd.f32 %v2696_v6, %v2492_v25  ;;  %v3830_v25 = vmov 0.0  }
0x1c41   :  { %v2713_v13 = vsel %vm70_vm0, %v2705_v7, 0.0  ;;  %3410 = vmatprep.mubr.msk.f32.mxu1 %vm3829_vm6, %v3830_v25 }
0x1c42   :  { %2714 = vadd.xlane.f32.xlu0 %v2713_v13  ;;  %v2710_v8 = vsel %vm70_vm0, %v2704_v40, 0.0 }
0x1c43   :  { %2711 = vadd.xlane.f32.xlu1 %v2710_v8 }
0x1ccf   :  { %v2715_v9 = vpop.xlane.xlu0 %2714 }
0x1cd0   :  { %v2717_v10 = vmul.f32 0.03125, %v2715_v9  ;;  %v2712_v11 = vpop.xlane.xlu1 %2711 }
0x1cd1   :  { %v2716_v48 = vmul.f32 0.03125, %v2712_v11 }
0x1cd2   :  { %v2719_v12 = vsub.f32 %v2705_v7, %v2717_v10 }
0x1cd3   :  { %v2718_v14 = vsub.f32 %v2704_v40, %v2716_v48 }
0x1cd4   :  { %v2721_v38 = vmul.f32 %v2719_v12, %v2719_v12 }
0x1cd5   :  { %v2720_v16 = vmul.f32 %v2718_v14, %v2718_v14 }
0x1cd6   :  { %v2725_v18 = vsel %vm70_vm0, %v2721_v38, 0.0 }
0x1cd7   :  { %2726 = vadd.xlane.f32.xlu0 %v2725_v18  ;;  %v2722_v19 = vsel %vm70_vm0, %v2720_v16, 0.0 }
0x1cd8   :  { %2723 = vadd.xlane.f32.xlu1 %v2722_v19 }
0x1d64   :  { %v2727_v26 = vpop.xlane.xlu0 %2726 }
0x1d65   :  { %v2729_v29 = vmul.f32 0.03125, %v2727_v26  ;;  %v2724_v31 = vpop.xlane.xlu1 %2723 }
0x1d66   :  { %v2728_v32 = vmul.f32 0.03125, %v2724_v31 }
0x1d67   :  { %v2731_v34 = vadd.f32 1e-12, %v2729_v29 }
0x1d68   :  { %v2730_v35 = vadd.f32 1e-12, %v2728_v32 }
0x1d69   :  { %3782 = vrsqrt.f32 %v2731_v34 }
0x1d6a   :  { %3784 = vrsqrt.f32 %v2730_v35 }
0x1d73   :  { %v3783_v30 = vpop.eup %3782 }
0x1d74   :  { %v3785_v36 = vpop.eup %3784  ;;  %v2735_v37 = vmul.f32 %v3783_v30, %v2719_v12 }
0x1d75   :  { %v2734_v39 = vmul.f32 %v3785_v36, %v2718_v14 }
0x1d76   :  { %v2743_v43 = vmul.f32 %v3050_v33, %v2735_v37 }
0x1d77   :  { %v2742_v44 = vmul.f32 %v3050_v33, %v2734_v39 }
0x1d78   :  { %v2751_v45 = vadd.f32 %v3051_v42, %v2743_v43 }
0x1d79   :  { %v2750_v46 = vadd.f32 %v3051_v42, %v2742_v44 }
0x1d7a   :  { %v2753_v47 = vrot.slane %v2751_v45, 7 }
0x1d7c   :  { %v2756_v49 = vsel %vm2755_vm7, %v2750_v46, %v2753_v47 }
0x1d7d   :  { %3411 = vmatmul.mubr.msk.f32.vlgmr.msra.gmra.mrb[22].mxu1 %vm70_vm0, %v2756_v49 }
0x1d7e   :  { %3421 = vmatprep.mubr.msk.f32.mxu1 %vm3829_vm6, %v3830_v25  ;;  %3592 = vmatpush3.bf16.msra.mxu1 %v3591_v53 }
0x1d7f   :  { %3593 = vmatprep.subr.bf16.mxu1 %v3828_v58 }
0x1d82   :  { %3595 = vmatpush3.bf16.msra.mxu1 %v3594_v51 }
0x1e50   :  { %v2837_v28 = vpop.f32.mrb[22].mxu1 }
0x1e51   :  { %v2838_v52 = vadd.f32 %v3052_v15, %v2837_v28  ;;  %v3412_v55 = vpop.f32.mrb[23].mxu1 }
0x1e53   :  { %3786 = vtanh.f32 %v2838_v52 }
0x1e5d   :  { %v3787_v27 = vpop.eup %3786 }
0x1e5e   :  { %3422 = vmatmul.mubr.msk.f32.vlgmr.msra.gmra.mrb[24].mxu1 %vm70_vm0, %v3787_v27 }
0x1f31   :  { %v2922_v59 = vpop.f32.mrb[24].mxu1 }
0x1f32   :  { %v2923_v61 = vadd.f32 %v3054_v56, %v2922_v59  ;;  %v3423_v62 = vpop.f32.mrb[25].mxu1 }
0x1f34   :  { %2927 = vst.msk [vmem:[#allocation2] sm:$0x3] %vm2926_vm8, %v2923_v61 }
0x1f35   :  { %3801 = shalt.err (!%p3798_p4)
}
0x1f36   :  { %s3802_s13 = scalar_lea.hbm %s4489_s20, 32 }
0x1f37   :  { %p3803_p5 = scmp.ne.s32.totalorder %s4489_s20, %s3802_s13  ;;  %p3806_p6 = scmp.lt.u32.totalorder %s3802_s13, %s4489_s20 }
0x1f39   :  { %p3808_p7 = pnand %p3806_p6, %p3803_p5 }
0x1f3b   :  { %3811 = shalt.err (!%p3808_p7)
}
0x1f3c   :  { %2937 = dma.vmem_to_hbm [thread:$0]  %s2935_s29, 32, %s4489_s20, [#allocation3]  }
0x1f3d   :  { %3812 = dma.done.wait [#allocation3], 32  }
0x1f3e   :  { %3813 = vsyncadd [#allocation3], 4294967264 }
0x1f3f   :  { %2941 = vsyncpa [#allocation3], 1 }

</bundles_post_ra>
